<compile_context>
chip_gen: v6e
topology: v6e:2x2x1
jax: 0.10.0
libtpu: 0.0.40
codegen_flags: <defaults>
</compile_context>

<pallas_src>
import functools

import jax
import jax.numpy as jnp
from jax.experimental import pallas as pl
from jax.experimental.pallas import tpu as pltpu

PACK = 32                              # samples packed per 128-lane row (32 * 4 = 128)
_HI = jax.lax.Precision.HIGHEST


def simplenet_kernel(flag_ref, x_ref, w1_ref, b1_ref, w2_ref, b2_ref, o_ref):
    # flag_ref : SMEM (1,) int32      -- 1 if global mean(x) > 0 else 0
    # x_ref    : VMEM (TR, 128) f32   -- 32 samples x 4 features per row
    # w1_ref   : VMEM (128, 256)      -- block-diag of 32 copies of W1^T (4x8)
    # b1_ref   : VMEM (1, 256)        -- b1 tiled 32x
    # w2_ref   : VMEM (256, 64)       -- block-diag of 32 copies of W2^T (8x2)
    # b2_ref   : VMEM (1, 64)         -- b2 tiled 32x
    # o_ref    : VMEM (TR, 64) f32    -- 32 samples x 2 outputs per row
    x = x_ref[...]

    # fc1 on the MXU (exact f32 via HIGHEST).  The block-diagonal weight makes
    # this packed matmul equivalent to 32 independent Linear(4,8) applications.
    h = jnp.dot(x, w1_ref[...], precision=_HI,
                preferred_element_type=jnp.float32) + b1_ref[...]

    def fc2_and_store(h_act):
        y = jnp.dot(h_act, w2_ref[...], precision=_HI,
                    preferred_element_type=jnp.float32) + b2_ref[...]
        o_ref[...] = y.astype(o_ref.dtype)

    flag = flag_ref[0]

    @pl.when(flag > 0)
    def _():
        fc2_and_store(jnp.maximum(h, 0.0))       # ReLU branch only

    @pl.when(flag <= 0)
    def _():
        fc2_and_store(jax.nn.sigmoid(h))         # sigmoid branch only


@functools.partial(jax.jit, static_argnames=("tile_b",))
def simplenet_forward(x, w1, b1, w2, b2, *, tile_b=65536):
    """x: (B, 4) f32.  w1: (8,4), b1: (8,), w2: (2,8), b2: (2,).  Returns (B, 2)."""
    B = x.shape[0]

    # Tile size in *samples*: multiple of 32*8=256 so the packed row tile
    # (tb/32, 128) is sublane-aligned.  Default 65536 samples/step amortizes the
    # ~0.35us per-grid-step overhead while the working set (~8 MiB) fits VMEM on
    # all generations (v7x included).
    tb = max(256, (tile_b // 256) * 256)
    padded_min = ((B + 255) // 256) * 256
    tb = min(tb, padded_min)
    padded_b = ((B + tb - 1) // tb) * tb
    grid = (padded_b // tb,)
    tr = tb // PACK                      # packed rows per tile (multiple of 8)
    rows = padded_b // PACK

    # Global branch condition over the *original* (unpadded) batch, prefetched
    # into SMEM.  XLA can fuse this reduce with the pad below.
    flag = (jnp.mean(x) > 0.0).astype(jnp.int32).reshape((1,))

    # Zero-copy packed layout: (B,4) -> (B/32, 128).  Pad only when needed.
    if padded_b != B:
        x = jnp.pad(x, ((0, padded_b - B), (0, 0)))
    x_packed = x.reshape(rows, 128)

    # Block-diagonal replicated weights/biases (tiny, resident in VMEM).
    eye = jnp.eye(PACK, dtype=jnp.float32)
    w1_blk = jnp.kron(eye, w1.T.astype(jnp.float32))                              # (128, 256)
    w2_blk = jnp.kron(eye, w2.T.astype(jnp.float32))                              # (256, 64)
    b1_blk = jnp.tile(b1.astype(jnp.float32).reshape(-1), PACK).reshape(1, -1)    # (1, 256)
    b2_blk = jnp.tile(b2.astype(jnp.float32).reshape(-1), PACK).reshape(1, -1)    # (1, 64)

    grid_spec = pltpu.PrefetchScalarGridSpec(
        num_scalar_prefetch=1,
        grid=grid,
        in_specs=[
            pl.BlockSpec((tr, 128), lambda i, flag: (i, 0)),     # x tile, pipelined
            pl.BlockSpec((128, 256), lambda i, flag: (0, 0)),    # W1 block-diag, resident
            pl.BlockSpec((1, 256), lambda i, flag: (0, 0)),      # b1, resident
            pl.BlockSpec((256, 64), lambda i, flag: (0, 0)),     # W2 block-diag, resident
            pl.BlockSpec((1, 64), lambda i, flag: (0, 0)),       # b2, resident
        ],
        out_specs=pl.BlockSpec((tr, 64), lambda i, flag: (i, 0)),
    )

    out_packed = pl.pallas_call(
        simplenet_kernel,
        out_shape=jax.ShapeDtypeStruct((rows, 64), jnp.float32),
        grid_spec=grid_spec,
        compiler_params=pltpu.CompilerParams(
            dimension_semantics=("parallel",),       # batch steps are independent
            vmem_limit_bytes=64 * 1024 * 1024,       # allow larger tiles than default scoped limit
        ),
    )(flag, x_packed, w1_blk, b1_blk, w2_blk, b2_blk)

    out = out_packed.reshape(padded_b, 2)            # zero-copy unpack back to (B, 2)
    if padded_b != B:
        out = out[:B]
    return out


def init_linear_params(key, fan_in, fan_out):
    # Deterministic init mimicking PyTorch nn.Linear default:
    # weight (out, in) and bias (out,) ~ U(-1/sqrt(fan_in), 1/sqrt(fan_in)).
    kw, kb = jax.random.split(key)
    bound = 1.0 / jnp.sqrt(jnp.float32(fan_in))
    w = jax.random.uniform(kw, (fan_out, fan_in), jnp.float32, -bound, bound)
    b = jax.random.uniform(kb, (fan_out,), jnp.float32, -bound, bound)
    return w, b


def _reference(x, w1, b1, w2, b2):
    h = jnp.dot(x, w1.T, precision=_HI) + b1
    h = jnp.where(jnp.mean(x) > 0.0, jnp.maximum(h, 0.0), jax.nn.sigmoid(h))
    return jnp.dot(h, w2.T, precision=_HI) + b2


if __name__ == "__main__":
    key = jax.random.PRNGKey(0)
    k_x, k_fc1, k_fc2 = jax.random.split(key, 3)

    w1, b1 = init_linear_params(k_fc1, 4, 8)   # (8,4), (8,)
    w2, b2 = init_linear_params(k_fc2, 8, 2)   # (2,8), (2,)

    # Small case from the spec (B=2); shifted so mean(x) > 0 -> ReLU branch.
    B = 2
    x = jax.random.normal(k_x, (B, 4), jnp.float32) + 1.0
    out = simplenet_forward(x, w1, b1, w2, b2)
    jax.block_until_ready(out)
    ref = _reference(x, w1, b1, w2, b2)
    assert out.shape == (B, 2)
    assert jnp.allclose(out, ref, atol=1e-5, rtol=1e-5), "mismatch vs JAX reference (B=2)"

    # Multi-step grid: B=1000 pads to 1024, tile=256 samples -> 4 grid steps,
    # sigmoid branch (mean forced <= 0), and exercises the tail pad/slice path.
    B2 = 1000
    x2 = jax.random.normal(jax.random.PRNGKey(7), (B2, 4), jnp.float32)
    x2 = x2 - jnp.abs(jnp.mean(x2)) - 1.0
    out2 = simplenet_forward(x2, w1, b1, w2, b2, tile_b=256)
    jax.block_until_ready(out2)
    ref2 = _reference(x2, w1, b1, w2, b2)
    assert out2.shape == (B2, 2)
    assert jnp.allclose(out2, ref2, atol=1e-5, rtol=1e-5), "mismatch vs JAX reference (B=1000)"

    print("KERNEL_OK")
</pallas_src>

<mosaic_0001>
module attributes {stable_mosaic.version = 11 : i64} {
  func.func @simplenet_kernel(%arg0: i32, %arg1: memref<1xi32, #tpu.memory_space<smem>>, %arg2: memref<8x128xf32, #tpu.memory_space<vmem>>, %arg3: memref<128x256xf32, #tpu.memory_space<vmem>>, %arg4: memref<1x256xf32, #tpu.memory_space<vmem>>, %arg5: memref<256x64xf32, #tpu.memory_space<vmem>>, %arg6: memref<1x64xf32, #tpu.memory_space<vmem>>, %arg7: memref<8x64xf32, #tpu.memory_space<vmem>>) attributes {dimension_semantics = [#tpu.dimension_semantics<parallel>], iteration_bounds = array<i64: 1>, scalar_prefetch = 1 : i64, scratch_operands = 0 : i64, tpu.core_type = #tpu.core_type<tc>, window_params = [{transform_indices = @transform_0, window_bounds = array<i64: 8, 128>}, {pipeline_mode = #tpu.pipeline_mode<synchronous>, transform_indices = @transform_1, window_bounds = array<i64: 128, 256>}, {pipeline_mode = #tpu.pipeline_mode<synchronous>, transform_indices = @transform_2, window_bounds = array<i64: 1, 256>}, {pipeline_mode = #tpu.pipeline_mode<synchronous>, transform_indices = @transform_3, window_bounds = array<i64: 256, 64>}, {pipeline_mode = #tpu.pipeline_mode<synchronous>, transform_indices = @transform_4, window_bounds = array<i64: 1, 64>}, {transform_indices = @transform_5, window_bounds = array<i64: 8, 64>}]} {
    %c0 = arith.constant 0 : index
    %c0_0 = arith.constant 0 : index
    %0 = vector.load %arg2[%c0, %c0_0] : memref<8x128xf32, #tpu.memory_space<vmem>>, vector<8x128xf32>
    %c0_1 = arith.constant 0 : index
    %c0_2 = arith.constant 0 : index
    %1 = vector.load %arg3[%c0_1, %c0_2] : memref<128x256xf32, #tpu.memory_space<vmem>>, vector<128x256xf32>
    %cst = arith.constant dense<0.000000e+00> : vector<8x256xf32>
    %2 = tpu.matmul %0, %1, %cst {dimension_numbers = #tpu.dot_dimension_numbers<[1], [0], [0], [1], [0, 0, 1, 1], [], []>, precision = #tpu.contract_precision<fp32>} : vector<8x128xf32>, vector<128x256xf32>, vector<8x256xf32> -> vector<8x256xf32>
    %c0_3 = arith.constant 0 : index
    %c0_4 = arith.constant 0 : index
    %3 = vector.load %arg4[%c0_3, %c0_4] : memref<1x256xf32, #tpu.memory_space<vmem>>, vector<1x256xf32>
    %4 = vector.broadcast %3 : vector<1x256xf32> to vector<8x256xf32>
    %5 = arith.addf %2, %4 : vector<8x256xf32>
    %c0_5 = arith.constant 0 : index
    %6 = memref.load %arg1[%c0_5] : memref<1xi32, #tpu.memory_space<smem>>
    %c0_i32 = arith.constant 0 : i32
    %7 = arith.cmpi sgt, %6, %c0_i32 : i32
    %8 = arith.extui %7 : i1 to i32
    %c0_i32_6 = arith.constant 0 : i32
    %9 = arith.cmpi ne, %8, %c0_i32_6 : i32
    scf.if %9 {
      %cst_9 = arith.constant 0.000000e+00 : f32
      %13 = vector.broadcast %cst_9 : f32 to vector<8x256xf32>
      %14 = arith.maximumf %5, %13 : vector<8x256xf32>
      %c0_10 = arith.constant 0 : index
      %c0_11 = arith.constant 0 : index
      %15 = vector.load %arg5[%c0_10, %c0_11] : memref<256x64xf32, #tpu.memory_space<vmem>>, vector<256x64xf32>
      %cst_12 = arith.constant dense<0.000000e+00> : vector<8x64xf32>
      %16 = tpu.matmul %14, %15, %cst_12 {dimension_numbers = #tpu.dot_dimension_numbers<[1], [0], [0], [1], [0, 0, 1, 1], [], []>, precision = #tpu.contract_precision<fp32>} : vector<8x256xf32>, vector<256x64xf32>, vector<8x64xf32> -> vector<8x64xf32>
      %c0_13 = arith.constant 0 : index
      %c0_14 = arith.constant 0 : index
      %17 = vector.load %arg6[%c0_13, %c0_14] : memref<1x64xf32, #tpu.memory_space<vmem>>, vector<1x64xf32>
      %18 = vector.broadcast %17 : vector<1x64xf32> to vector<8x64xf32>
      %19 = arith.addf %16, %18 : vector<8x64xf32>
      %c0_15 = arith.constant 0 : index
      %c0_16 = arith.constant 0 : index
      %20 = vector.load %arg7[%c0_15, %c0_16] : memref<8x64xf32, #tpu.memory_space<vmem>>, vector<8x64xf32>
      tpu.vector_store %arg7[%c0_15, %c0_16], %19 {strides = array<i32>} : memref<8x64xf32, #tpu.memory_space<vmem>>, vector<8x64xf32>,
    } else {
    }
    %c0_i32_7 = arith.constant 0 : i32
    %10 = arith.cmpi sle, %6, %c0_i32_7 : i32
    %11 = arith.extui %10 : i1 to i32
    %c0_i32_8 = arith.constant 0 : i32
    %12 = arith.cmpi ne, %11, %c0_i32_8 : i32
    scf.if %12 {
      %13 = arith.negf %5 : vector<8x256xf32>
      %14 = math.exp %13 : vector<8x256xf32>
      %cst_9 = arith.constant 1.000000e+00 : f32
      %15 = vector.broadcast %cst_9 : f32 to vector<8x256xf32>
      %16 = arith.addf %15, %14 : vector<8x256xf32>
      %17 = arith.divf %15, %16 : vector<8x256xf32>
      %c0_10 = arith.constant 0 : index
      %c0_11 = arith.constant 0 : index
      %18 = vector.load %arg5[%c0_10, %c0_11] : memref<256x64xf32, #tpu.memory_space<vmem>>, vector<256x64xf32>
      %cst_12 = arith.constant dense<0.000000e+00> : vector<8x64xf32>
      %19 = tpu.matmul %17, %18, %cst_12 {dimension_numbers = #tpu.dot_dimension_numbers<[1], [0], [0], [1], [0, 0, 1, 1], [], []>, precision = #tpu.contract_precision<fp32>} : vector<8x256xf32>, vector<256x64xf32>, vector<8x64xf32> -> vector<8x64xf32>
      %c0_13 = arith.constant 0 : index
      %c0_14 = arith.constant 0 : index
      %20 = vector.load %arg6[%c0_13, %c0_14] : memref<1x64xf32, #tpu.memory_space<vmem>>, vector<1x64xf32>
      %21 = vector.broadcast %20 : vector<1x64xf32> to vector<8x64xf32>
      %22 = arith.addf %19, %21 : vector<8x64xf32>
      %c0_15 = arith.constant 0 : index
      %c0_16 = arith.constant 0 : index
      %23 = vector.load %arg7[%c0_15, %c0_16] : memref<8x64xf32, #tpu.memory_space<vmem>>, vector<8x64xf32>
      tpu.vector_store %arg7[%c0_15, %c0_16], %22 {strides = array<i32>} : memref<8x64xf32, #tpu.memory_space<vmem>>, vector<8x64xf32>,
    } else {
    }
    return
  }
  func.func @transform_0(%arg0: i32, %arg1: memref<1xi32, #tpu.memory_space<smem>>) -> (i32, i32) {
    %c0_i32 = arith.constant 0 : i32
    %c0_i32_0 = arith.constant 0 : i32
    return %arg0, %c0_i32 : i32, i32
  }
  func.func @transform_1(%arg0: i32, %arg1: memref<1xi32, #tpu.memory_space<smem>>) -> (i32, i32) {
    %c0_i32 = arith.constant 0 : i32
    %c0_i32_0 = arith.constant 0 : i32
    %c0_i32_1 = arith.constant 0 : i32
    return %c0_i32, %c0_i32_0 : i32, i32
  }
  func.func @transform_2(%arg0: i32, %arg1: memref<1xi32, #tpu.memory_space<smem>>) -> (i32, i32) {
    %c0_i32 = arith.constant 0 : i32
    %c0_i32_0 = arith.constant 0 : i32
    %c0_i32_1 = arith.constant 0 : i32
    return %c0_i32, %c0_i32_0 : i32, i32
  }
  func.func @transform_3(%arg0: i32, %arg1: memref<1xi32, #tpu.memory_space<smem>>) -> (i32, i32) {
    %c0_i32 = arith.constant 0 : i32
    %c0_i32_0 = arith.constant 0 : i32
    %c0_i32_1 = arith.constant 0 : i32
    return %c0_i32, %c0_i32_0 : i32, i32
  }
  func.func @transform_4(%arg0: i32, %arg1: memref<1xi32, #tpu.memory_space<smem>>) -> (i32, i32) {
    %c0_i32 = arith.constant 0 : i32
    %c0_i32_0 = arith.constant 0 : i32
    %c0_i32_1 = arith.constant 0 : i32
    return %c0_i32, %c0_i32_0 : i32, i32
  }
  func.func @transform_5(%arg0: i32, %arg1: memref<1xi32, #tpu.memory_space<smem>>) -> (i32, i32) {
    %c0_i32 = arith.constant 0 : i32
    %c0_i32_0 = arith.constant 0 : i32
    return %arg0, %c0_i32 : i32, i32
  }
}

</mosaic_0001>

<bundles_post_ra>
// kernel: tile.13
= control target key start
LH: loop header
LB: loop body
LE: loop exit
PB: predicated region body
PF: predicated region fallthrough
CT: control target
= control target key end

     0   :  { %s40_s0 = inlined_call_operand.vmem [shape: f32[8], index: 0, kind: input, shape index: {}]   ;;  %s41_s1 = inlined_call_operand.vmem [shape: f32[32,8], index: 1, kind: output, shape index: {}]  }
   0x1   :  { %v4_v0 = vld [vmem:[%s40_s0] ss:$0 sm:$0xff] }
   0x2   :  { %5 = vst [vmem:[%s41_s1] sm:$0xff] %v4_v0  ;;  %12 = vst [vmem:[%s41_s1 + $0x8] sm:$0xff] %v4_v0 }
   0x3   :  { %13 = vst [vmem:[%s41_s1 + $0x10] sm:$0xff] %v4_v0  ;;  %14 = vst [vmem:[%s41_s1 + $0x18] sm:$0xff] %v4_v0 }

// kernel: tile.14
= control target key start
LH: loop header
LB: loop body
LE: loop exit
PB: predicated region body
PF: predicated region fallthrough
CT: control target
= control target key end

     0   :  { %s7_s6 = smov 3  ;;  %s21_s9 = smov 3  ;;  %vm4_vm0 = vcmask 64512   ;;  %vm11_vm1 = vcmask 1048512   ;;  %vm18_vm2 = vcmask 982912   ;;  %vm25_vm3 = vcmask 917312   ;;  %s235_s0 = inlined_call_operand.vmem [shape: f32[32,8], index: 0, kind: input, shape index: {}]   ;;  %s236_s1 = inlined_call_operand.vmem [shape: f32[1,256], index: 1, kind: output, shape index: {}]  }
   0x1   :  { %v125_v0 = vld [vmem:[%s235_s0 + $0xf] ss:$16 sm:%s7_s6]   ;;  %s156_s10 = smov 120   ;;  %v127_v1 = vld [vmem:[%s235_s0 + $0xd] ss:$16 sm:%s21_s9]   ;;  %s14_s13 = smov 3 }
   0x2   :  { %9 = vrot.lane.b32.xlu0 %v125_v0, %s156_s10  ;;  %s157_s14 = smov 104   ;;  %v126_v2 = vld [vmem:[%s235_s0 + $0xe] ss:$16 sm:%s14_s13]   ;;  %s28_s17 = smov 3  ;;  %vm32_vm4 = vcmask 851712   ;;  %vm39_vm5 = vcmask 786112  }
   0x3   :  { %23 = vrot.lane.b32.xlu1 %v127_v1, %s157_s14  ;;  %v128_v3 = vld [vmem:[%s235_s0 + $0xc] ss:$16 sm:%s28_s17]   ;;  %s35_s20 = smov 3  ;;  %s42_s21 = smov 3  ;;  %vm46_vm6 = vcmask 720512   ;;  %vm53_vm7 = vcmask 654912  }
   0x4   :  { %s158_s22 = smov 112   ;;  %s159_s23 = smov 96   ;;  %v129_v4 = vld [vmem:[%s235_s0 + $0xb] ss:$16 sm:%s35_s20]   ;;  %v130_v5 = vld [vmem:[%s235_s0 + $0xa] ss:$16 sm:%s42_s21]  }
   0x5   :  { %s49_s28 = smov 3  ;;  %s56_s29 = smov 3  ;;  %vm60_vm8 = vcmask 589312   ;;  %vm67_vm9 = vcmask 523712   ;;  %vm74_vm10 = vcmask 458112   ;;  %vm81_vm11 = vcmask 392512  }
   0x6   :  { %16 = vrot.lane.b32.xlu0 %v126_v2, %s158_s22  ;;  %s160_s30 = smov 88   ;;  %s161_s2 = smov 80   ;;  %v131_v6 = vld [vmem:[%s235_s0 + $0x9] ss:$16 sm:%s49_s28]   ;;  %vm88_vm12 = vcmask 326912   ;;  %vm95_vm13 = vcmask 261312  }
   0x7   :  { %30 = vrot.lane.b32.xlu1 %v128_v3, %s159_s23  ;;  %v132_v7 = vld [vmem:[%s235_s0 + $0x8] ss:$16 sm:%s56_s29]   ;;  %s63_s7 = smov 3  ;;  %s70_s8 = smov 3  ;;  %vm102_vm14 = vcmask 195712   ;;  %vm109_vm15 = vcmask 130112  }
   0x8   :  { %s162_s9 = smov 72   ;;  %s163_s10 = smov 64   ;;  %v133_v8 = vld [vmem:[%s235_s0 + $0x7] ss:$16 sm:%s63_s7]   ;;  %v134_v9 = vld [vmem:[%s235_s0 + $0x6] ss:$16 sm:%s70_s8]  }
   0x9   :  { %s2_s13 = smov 3  ;;  %s77_s16 = smov 3 }
   0xa   :  { %37 = vrot.lane.b32.xlu0 %v129_v4, %s160_s30  ;;  %v3_v10 = vld [vmem:[%s235_s0] ss:$16 sm:%s2_s13]   ;;  %s84_s19 = smov 3  ;;  %s164_s20 = smov 56  }
   0xb   :  { %44 = vrot.lane.b32.xlu1 %v130_v5, %s161_s2  ;;  %5 = vst.msk [vmem:[#allocation0] ss:$8 sm:$0x3] %vm4_vm0, %v3_v10   ;;  %s165_s21 = smov 48   ;;  %v135_v11 = vld [vmem:[%s235_s0 + $0x5] ss:$16 sm:%s77_s16]  }
   0xc   :  { %v136_v12 = vld [vmem:[%s235_s0 + $0x4] ss:$16 sm:%s84_s19]   ;;  %s91_s26 = smov 3  ;;  %s98_s27 = smov 3 }
   0xd   :  { %s166_s28 = smov 40   ;;  %s167_s29 = smov 32   ;;  %v137_v13 = vld [vmem:[%s235_s0 + $0x3] ss:$16 sm:%s91_s26]   ;;  %v138_v14 = vld [vmem:[%s235_s0 + $0x2] ss:$16 sm:%s98_s27]  }
   0xe   :  { %51 = vrot.lane.b32.xlu0 %v131_v6, %s162_s9  ;;  %s105_s5 = smov 3  ;;  %s168_s6 = smov 24  }
   0xf   :  { %58 = vrot.lane.b32.xlu1 %v132_v7, %s163_s10  ;;  %s169_s7 = smov 16   ;;  %v139_v15 = vld [vmem:[%s235_s0 + $0x1] ss:$16 sm:%s105_s5]   ;;  %s170_s0 = smov 8  }
  0x12   :  { %65 = vrot.lane.b32.xlu0 %v133_v8, %s164_s20 }
  0x13   :  { %72 = vrot.lane.b32.xlu1 %v134_v9, %s165_s21 }
  0x16   :  { %79 = vrot.lane.b32.xlu0 %v135_v11, %s166_s28 }
  0x17   :  { %86 = vrot.lane.b32.xlu1 %v136_v12, %s167_s29 }
  0x1a   :  { %93 = vrot.lane.b32.xlu0 %v137_v13, %s168_s6 }
  0x1b   :  { %100 = vrot.lane.b32.xlu1 %v138_v14, %s169_s7 }
  0x1e   :  { %107 = vrot.lane.b32.xlu0 %v139_v15, %s170_s0 }
  0x74   :  { %v10_v16 = vpop.permute.xlu0 %9  }
  0x75   :  { %12 = vst.msk [vmem:[#allocation0] ss:$8 sm:$0x3] %vm11_vm1, %v10_v16   ;;  %v24_v17 = vpop.permute.xlu1 %23  }
  0x78   :  { %v17_v18 = vpop.permute.xlu0 %16  }
  0x79   :  { %19 = vst.msk [vmem:[#allocation0] ss:$8 sm:$0x3] %vm18_vm2, %v17_v18   ;;  %v31_v19 = vpop.permute.xlu1 %30  }
  0x7a   :  { %26 = vst.msk [vmem:[#allocation0] ss:$8 sm:$0x3] %vm25_vm3, %v24_v17  }
  0x7b   :  { %33 = vst.msk [vmem:[#allocation0] ss:$8 sm:$0x3] %vm32_vm4, %v31_v19  }
  0x7c   :  { %v38_v20 = vpop.permute.xlu0 %37  }
  0x7d   :  { %40 = vst.msk [vmem:[#allocation0] ss:$8 sm:$0x3] %vm39_vm5, %v38_v20   ;;  %v45_v21 = vpop.permute.xlu1 %44  }
  0x7e   :  { %47 = vst.msk [vmem:[#allocation0] ss:$8 sm:$0x3] %vm46_vm6, %v45_v21  }
  0x80   :  { %v52_v22 = vpop.permute.xlu0 %51  }
  0x81   :  { %54 = vst.msk [vmem:[#allocation0] ss:$8 sm:$0x3] %vm53_vm7, %v52_v22   ;;  %v59_v23 = vpop.permute.xlu1 %58  }
  0x82   :  { %61 = vst.msk [vmem:[#allocation0] ss:$8 sm:$0x3] %vm60_vm8, %v59_v23  }
  0x84   :  { %v66_v24 = vpop.permute.xlu0 %65  }
  0x85   :  { %68 = vst.msk [vmem:[#allocation0] ss:$8 sm:$0x3] %vm67_vm9, %v66_v24   ;;  %v73_v25 = vpop.permute.xlu1 %72  }
  0x86   :  { %75 = vst.msk [vmem:[#allocation0] ss:$8 sm:$0x3] %vm74_vm10, %v73_v25  }
  0x88   :  { %v80_v26 = vpop.permute.xlu0 %79  }
  0x89   :  { %82 = vst.msk [vmem:[#allocation0] ss:$8 sm:$0x3] %vm81_vm11, %v80_v26   ;;  %v87_v27 = vpop.permute.xlu1 %86  }
  0x8a   :  { %89 = vst.msk [vmem:[#allocation0] ss:$8 sm:$0x3] %vm88_vm12, %v87_v27  }
  0x8c   :  { %v94_v28 = vpop.permute.xlu0 %93  }
  0x8d   :  { %96 = vst.msk [vmem:[#allocation0] ss:$8 sm:$0x3] %vm95_vm13, %v94_v28   ;;  %v101_v29 = vpop.permute.xlu1 %100  }
  0x8e   :  { %103 = vst.msk [vmem:[#allocation0] ss:$8 sm:$0x3] %vm102_vm14, %v101_v29  }
  0x90   :  { %v108_v30 = vpop.permute.xlu0 %107  }
  0x91   :  { %110 = vst.msk [vmem:[#allocation0] ss:$8 sm:$0x3] %vm109_vm15, %v108_v30  }
  0x98   :  { %v115_v31 = vld [vmem:[#allocation0] sm:$0x1]  ;;  %v120_v32 = vld [vmem:[#allocation0 + $0x8] sm:$0x1] }
  0x99   :  { %118 = vst [vmem:[%s236_s1] sm:$0x1] %v115_v31  ;;  %140 = vst [vmem:[%s236_s1 + $0x1] sm:$0x1] %v120_v32 }

// kernel: tile.18
= control target key start
LH: loop header
LB: loop body
LE: loop exit
PB: predicated region body
PF: predicated region fallthrough
CT: control target
= control target key end

     0   :  { %s40_s0 = inlined_call_operand.vmem [shape: f32[2], index: 0, kind: input, shape index: {}]   ;;  %s41_s1 = inlined_call_operand.vmem [shape: f32[32,2], index: 1, kind: output, shape index: {}]  }
   0x1   :  { %v4_v0 = vld [vmem:[%s40_s0] ss:$0 sm:$0xff] }
   0x2   :  { %5 = vst [vmem:[%s41_s1] sm:$0xff] %v4_v0  ;;  %12 = vst [vmem:[%s41_s1 + $0x8] sm:$0xff] %v4_v0 }
   0x3   :  { %13 = vst [vmem:[%s41_s1 + $0x10] sm:$0xff] %v4_v0  ;;  %14 = vst [vmem:[%s41_s1 + $0x18] sm:$0xff] %v4_v0 }

// kernel: tile.19
= control target key start
LH: loop header
LB: loop body
LE: loop exit
PB: predicated region body
PF: predicated region fallthrough
CT: control target
= control target key end

     0   :  { %s261_s10 = smov 62   ;;  %s262_s11 = smov 58   ;;  %vm3_vm0 = vcmask 15360   ;;  %vm9_vm1 = vcmask 523760   ;;  %vm15_vm2 = vcmask 507360   ;;  %vm21_vm3 = vcmask 490960   ;;  %s401_s0 = inlined_call_operand.vmem [shape: f32[32,2], index: 0, kind: input, shape index: {}]   ;;  %s402_s1 = inlined_call_operand.vmem [shape: f32[1,64], index: 1, kind: output, shape index: {}]  }
   0x1   :  { %v199_v0 = vld [vmem:[%s401_s0 + $0x1f] sm:$0x1]   ;;  %v201_v1 = vld [vmem:[%s401_s0 + $0x1d] sm:$0x1]   ;;  %v200_v2 = vld [vmem:[%s401_s0 + $0x1e] sm:$0x1]  }
   0x2   :  { %7 = vrot.lane.b32.xlu0 %v199_v0, %s261_s10  ;;  %19 = vrot.lane.b32.xlu1 %v201_v1, %s262_s11  ;;  %v202_v3 = vld [vmem:[%s401_s0 + $0x1c] sm:$0x1]   ;;  %s263_s16 = smov 60   ;;  %s264_s17 = smov 56   ;;  %v203_v4 = vld [vmem:[%s401_s0 + $0x1b] sm:$0x1]  }
   0x3   :  { %v204_v5 = vld [vmem:[%s401_s0 + $0x1a] sm:$0x1]   ;;  %s265_s22 = smov 54   ;;  %s266_s23 = smov 52   ;;  %v205_v6 = vld [vmem:[%s401_s0 + $0x19] sm:$0x1]  }
   0x4   :  { %v206_v7 = vld [vmem:[%s401_s0 + $0x18] sm:$0x1]   ;;  %s267_s28 = smov 50   ;;  %s268_s29 = smov 48   ;;  %v207_v8 = vld [vmem:[%s401_s0 + $0x17] sm:$0x1]  }
   0x5   :  { %v208_v9 = vld [vmem:[%s401_s0 + $0x16] sm:$0x1]   ;;  %v2_v10 = vld [vmem:[%s401_s0] sm:$0x1]   ;;  %s269_s7 = smov 46   ;;  %s270_s8 = smov 44  }
   0x6   :  { %13 = vrot.lane.b32.xlu0 %v200_v2, %s263_s16  ;;  %25 = vrot.lane.b32.xlu1 %v202_v3, %s264_s17  ;;  %4 = vst.msk [vmem:[#allocation0] sm:$0x1] %vm3_vm0, %v2_v10   ;;  %v209_v11 = vld [vmem:[%s401_s0 + $0x15] sm:$0x1]   ;;  %v210_v12 = vld [vmem:[%s401_s0 + $0x14] sm:$0x1]  }
   0x7   :  { %s271_s13 = smov 42   ;;  %s272_s14 = smov 40   ;;  %v211_v13 = vld [vmem:[%s401_s0 + $0x13] sm:$0x1]   ;;  %v212_v14 = vld [vmem:[%s401_s0 + $0x12] sm:$0x1]  }
   0x8   :  { %s273_s19 = smov 38   ;;  %s274_s20 = smov 36   ;;  %v213_v15 = vld [vmem:[%s401_s0 + $0x11] sm:$0x1]   ;;  %v214_v16 = vld [vmem:[%s401_s0 + $0x10] sm:$0x1]  }
   0x9   :  { %s275_s25 = smov 34   ;;  %s276_s26 = smov 32   ;;  %v215_v17 = vld [vmem:[%s401_s0 + $0xf] sm:$0x1]   ;;  %v216_v18 = vld [vmem:[%s401_s0 + $0xe] sm:$0x1]  }
   0xa   :  { %31 = vrot.lane.b32.xlu0 %v203_v4, %s265_s22  ;;  %37 = vrot.lane.b32.xlu1 %v204_v5, %s266_s23  ;;  %s277_s2 = smov 30   ;;  %s278_s3 = smov 28   ;;  %v217_v19 = vld [vmem:[%s401_s0 + $0xd] sm:$0x1]   ;;  %v218_v20 = vld [vmem:[%s401_s0 + $0xc] sm:$0x1]  }
   0xb   :  { %s280_s9 = smov 24   ;;  %v219_v21 = vld [vmem:[%s401_s0 + $0xb] sm:$0x1]   ;;  %v220_v22 = vld [vmem:[%s401_s0 + $0xa] sm:$0x1]   ;;  %s282_s15 = smov 20  }
   0xc   :  { %v221_v23 = vld [vmem:[%s401_s0 + $0x9] sm:$0x1]   ;;  %v222_v24 = vld [vmem:[%s401_s0 + $0x8] sm:$0x1]   ;;  %s284_s21 = smov 16   ;;  %s286_s27 = smov 12  }
   0xd   :  { %v223_v25 = vld [vmem:[%s401_s0 + $0x7] sm:$0x1]   ;;  %v224_v26 = vld [vmem:[%s401_s0 + $0x6] sm:$0x1]   ;;  %v225_v27 = vld [vmem:[%s401_s0 + $0x5] sm:$0x1]  }
   0xe   :  { %43 = vrot.lane.b32.xlu0 %v205_v6, %s267_s28  ;;  %49 = vrot.lane.b32.xlu1 %v206_v7, %s268_s29  ;;  %v226_v28 = vld [vmem:[%s401_s0 + $0x4] sm:$0x1]   ;;  %s288_s4 = smov 8   ;;  %v227_v29 = vld [vmem:[%s401_s0 + $0x3] sm:$0x1]   ;;  %s290_s10 = smov 4  }
   0xf   :  { %v228_v30 = vld [vmem:[%s401_s0 + $0x2] sm:$0x1]   ;;  %v229_v31 = vld [vmem:[%s401_s0 + $0x1] sm:$0x1]   ;;  %s291_s0 = smov 2   ;;  %vm27_vm4 = vcmask 474560  }
  0x10   :  { %vm33_vm5 = vcmask 458160   ;;  %vm39_vm6 = vcmask 441760   ;;  %vm45_vm7 = vcmask 425360   ;;  %vm51_vm8 = vcmask 408960  }
  0x11   :  { %vm57_vm9 = vcmask 392560   ;;  %vm63_vm10 = vcmask 376160   ;;  %vm69_vm11 = vcmask 359760   ;;  %vm75_vm12 = vcmask 343360  }
  0x12   :  { %55 = vrot.lane.b32.xlu0 %v207_v8, %s269_s7  ;;  %61 = vrot.lane.b32.xlu1 %v208_v9, %s270_s8  ;;  %s279_s8 = smov 26   ;;  %vm81_vm13 = vcmask 326960   ;;  %vm87_vm14 = vcmask 310560   ;;  %vm93_vm15 = vcmask 294160   ;;  %vm99_vm0 = vcmask 277760  }
  0x16   :  { %67 = vrot.lane.b32.xlu0 %v209_v11, %s271_s13  ;;  %73 = vrot.lane.b32.xlu1 %v210_v12, %s272_s14  ;;  %s281_s14 = smov 22  }
  0x1a   :  { %79 = vrot.lane.b32.xlu0 %v211_v13, %s273_s19  ;;  %85 = vrot.lane.b32.xlu1 %v212_v14, %s274_s20  ;;  %s283_s20 = smov 18  }
  0x1e   :  { %91 = vrot.lane.b32.xlu0 %v213_v15, %s275_s25  ;;  %97 = vrot.lane.b32.xlu1 %v214_v16, %s276_s26  ;;  %s285_s26 = smov 14  }
  0x22   :  { %103 = vrot.lane.b32.xlu0 %v215_v17, %s277_s2  ;;  %109 = vrot.lane.b32.xlu1 %v216_v18, %s278_s3  ;;  %s287_s3 = smov 10  }
  0x26   :  { %115 = vrot.lane.b32.xlu0 %v217_v19, %s279_s8  ;;  %121 = vrot.lane.b32.xlu1 %v218_v20, %s280_s9  ;;  %s289_s9 = smov 6  }
  0x2a   :  { %127 = vrot.lane.b32.xlu0 %v219_v21, %s281_s14  ;;  %133 = vrot.lane.b32.xlu1 %v220_v22, %s282_s15 }
  0x2e   :  { %139 = vrot.lane.b32.xlu0 %v221_v23, %s283_s20  ;;  %145 = vrot.lane.b32.xlu1 %v222_v24, %s284_s21 }
  0x32   :  { %151 = vrot.lane.b32.xlu0 %v223_v25, %s285_s26  ;;  %157 = vrot.lane.b32.xlu1 %v224_v26, %s286_s27 }
  0x36   :  { %163 = vrot.lane.b32.xlu0 %v225_v27, %s287_s3  ;;  %169 = vrot.lane.b32.xlu1 %v226_v28, %s288_s4 }
  0x3a   :  { %175 = vrot.lane.b32.xlu0 %v227_v29, %s289_s9  ;;  %181 = vrot.lane.b32.xlu1 %v228_v30, %s290_s10 }
  0x3e   :  { %187 = vrot.lane.b32.xlu0 %v229_v31, %s291_s0 }
  0x74   :  { %v8_v32 = vpop.permute.xlu0 %7   ;;  %v20_v33 = vpop.permute.xlu1 %19  }
  0x75   :  { %10 = vst.msk [vmem:[#allocation0] sm:$0x1] %vm9_vm1, %v8_v32   ;;  %vm105_vm1 = vcmask 261360  }
  0x78   :  { %v14_v34 = vpop.permute.xlu0 %13   ;;  %v26_v35 = vpop.permute.xlu1 %25  }
  0x79   :  { %16 = vst.msk [vmem:[#allocation0] sm:$0x1] %vm15_vm2, %v14_v34   ;;  %vm111_vm2 = vcmask 244960  }
  0x7a   :  { %22 = vst.msk [vmem:[#allocation0] sm:$0x1] %vm21_vm3, %v20_v33   ;;  %vm117_vm3 = vcmask 228560  }
  0x7b   :  { %28 = vst.msk [vmem:[#allocation0] sm:$0x1] %vm27_vm4, %v26_v35   ;;  %vm123_vm4 = vcmask 212160  }
  0x7c   :  { %v32_v36 = vpop.permute.xlu0 %31   ;;  %v38_v37 = vpop.permute.xlu1 %37  }
  0x7d   :  { %34 = vst.msk [vmem:[#allocation0] sm:$0x1] %vm33_vm5, %v32_v36   ;;  %vm129_vm5 = vcmask 195760  }
  0x7e   :  { %40 = vst.msk [vmem:[#allocation0] sm:$0x1] %vm39_vm6, %v38_v37   ;;  %vm135_vm6 = vcmask 179360  }
  0x80   :  { %v44_v38 = vpop.permute.xlu0 %43   ;;  %v50_v39 = vpop.permute.xlu1 %49  }
  0x81   :  { %46 = vst.msk [vmem:[#allocation0] sm:$0x1] %vm45_vm7, %v44_v38   ;;  %vm141_vm7 = vcmask 162960  }
  0x82   :  { %52 = vst.msk [vmem:[#allocation0] sm:$0x1] %vm51_vm8, %v50_v39   ;;  %vm147_vm8 = vcmask 146560  }
  0x84   :  { %v56_v40 = vpop.permute.xlu0 %55   ;;  %v62_v41 = vpop.permute.xlu1 %61  }
  0x85   :  { %58 = vst.msk [vmem:[#allocation0] sm:$0x1] %vm57_vm9, %v56_v40   ;;  %vm153_vm9 = vcmask 130160  }
  0x86   :  { %64 = vst.msk [vmem:[#allocation0] sm:$0x1] %vm63_vm10, %v62_v41   ;;  %vm159_vm10 = vcmask 113760  }
  0x88   :  { %v68_v42 = vpop.permute.xlu0 %67   ;;  %v74_v43 = vpop.permute.xlu1 %73  }
  0x89   :  { %70 = vst.msk [vmem:[#allocation0] sm:$0x1] %vm69_vm11, %v68_v42   ;;  %vm165_vm11 = vcmask 97360  }
  0x8a   :  { %76 = vst.msk [vmem:[#allocation0] sm:$0x1] %vm75_vm12, %v74_v43   ;;  %vm171_vm12 = vcmask 80960  }
  0x8c   :  { %v80_v44 = vpop.permute.xlu0 %79   ;;  %v86_v45 = vpop.permute.xlu1 %85  }
  0x8d   :  { %82 = vst.msk [vmem:[#allocation0] sm:$0x1] %vm81_vm13, %v80_v44   ;;  %vm177_vm13 = vcmask 64560  }
  0x8e   :  { %88 = vst.msk [vmem:[#allocation0] sm:$0x1] %vm87_vm14, %v86_v45   ;;  %vm183_vm14 = vcmask 48160  }
  0x90   :  { %v92_v46 = vpop.permute.xlu0 %91   ;;  %v98_v47 = vpop.permute.xlu1 %97  }
  0x91   :  { %94 = vst.msk [vmem:[#allocation0] sm:$0x1] %vm93_vm15, %v92_v46   ;;  %vm189_vm15 = vcmask 31760  }
  0x92   :  { %100 = vst.msk [vmem:[#allocation0] sm:$0x1] %vm99_vm0, %v98_v47  }
  0x94   :  { %v104_v48 = vpop.permute.xlu0 %103   ;;  %v110_v49 = vpop.permute.xlu1 %109  }
  0x95   :  { %106 = vst.msk [vmem:[#allocation0] sm:$0x1] %vm105_vm1, %v104_v48  }
  0x96   :  { %112 = vst.msk [vmem:[#allocation0] sm:$0x1] %vm111_vm2, %v110_v49  }
  0x98   :  { %v116_v50 = vpop.permute.xlu0 %115   ;;  %v122_v51 = vpop.permute.xlu1 %121  }
  0x99   :  { %118 = vst.msk [vmem:[#allocation0] sm:$0x1] %vm117_vm3, %v116_v50  }
  0x9a   :  { %124 = vst.msk [vmem:[#allocation0] sm:$0x1] %vm123_vm4, %v122_v51  }
  0x9c   :  { %v128_v52 = vpop.permute.xlu0 %127   ;;  %v134_v53 = vpop.permute.xlu1 %133  }
  0x9d   :  { %130 = vst.msk [vmem:[#allocation0] sm:$0x1] %vm129_vm5, %v128_v52  }
  0x9e   :  { %136 = vst.msk [vmem:[#allocation0] sm:$0x1] %vm135_vm6, %v134_v53  }
  0xa0   :  { %v140_v54 = vpop.permute.xlu0 %139   ;;  %v146_v55 = vpop.permute.xlu1 %145  }
  0xa1   :  { %142 = vst.msk [vmem:[#allocation0] sm:$0x1] %vm141_vm7, %v140_v54  }
  0xa2   :  { %148 = vst.msk [vmem:[#allocation0] sm:$0x1] %vm147_vm8, %v146_v55  }
  0xa4   :  { %v152_v56 = vpop.permute.xlu0 %151   ;;  %v158_v57 = vpop.permute.xlu1 %157  }
  0xa5   :  { %154 = vst.msk [vmem:[#allocation0] sm:$0x1] %vm153_vm9, %v152_v56  }
  0xa6   :  { %160 = vst.msk [vmem:[#allocation0] sm:$0x1] %vm159_vm10, %v158_v57  }
  0xa8   :  { %v164_v58 = vpop.permute.xlu0 %163   ;;  %v170_v59 = vpop.permute.xlu1 %169  }
  0xa9   :  { %166 = vst.msk [vmem:[#allocation0] sm:$0x1] %vm165_vm11, %v164_v58  }
  0xaa   :  { %172 = vst.msk [vmem:[#allocation0] sm:$0x1] %vm171_vm12, %v170_v59  }
  0xac   :  { %v176_v60 = vpop.permute.xlu0 %175   ;;  %v182_v61 = vpop.permute.xlu1 %181  }
  0xad   :  { %178 = vst.msk [vmem:[#allocation0] sm:$0x1] %vm177_vm13, %v176_v60  }
  0xae   :  { %184 = vst.msk [vmem:[#allocation0] sm:$0x1] %vm183_vm14, %v182_v61  }
  0xb0   :  { %v188_v62 = vpop.permute.xlu0 %187  }
  0xb1   :  { %190 = vst.msk [vmem:[#allocation0] sm:$0x1] %vm189_vm15, %v188_v62  }
  0xb8   :  { %v195_v63 = vld [vmem:[#allocation0] sm:$0x1] }
  0xb9   :  { %198 = vst [vmem:[%s402_s1] sm:$0x1] %v195_v63 }

// kernel: simplenet_forward.1
= control target key start
LH: loop header
LB: loop body
LE: loop exit
PB: predicated region body
PF: predicated region fallthrough
CT: control target
= control target key end

     0   :  { %v5275_v3 = vmov 0.0   ;;  %s5254_s0 = inlined_call_operand.<no memory space> [shape: s32[1], index: 0, kind: input, shape index: {}]   ;;  %s5255_s2 = inlined_call_operand.vmem [shape: f32[128,256], index: 2, kind: input, shape index: {}]   ;;  %s5256_s4 = inlined_call_operand.vmem [shape: f32[256,64], index: 4, kind: input, shape index: {}]   ;;  %s5257_s5 = inlined_call_operand.vmem [shape: f32[1,64], index: 5, kind: input, shape index: {}]   ;;  %s5258_s6 = inlined_call_operand.vmem [shape: f32[8,64], index: 6, kind: output, shape index: {}]   ;;  %s5259_s1 = inlined_call_operand.vmem [shape: f32[8,128], index: 1, kind: input, shape index: {}]   ;;  %s5260_s3 = inlined_call_operand.vmem [shape: f32[1,256], index: 3, kind: input, shape index: {}]  }
   0x1   :  { %v54_v0 = vld [vmem:[%s5255_s2 + $0xf8] sm:$0xff]  ;;  %v53_v1 = vld [vmem:[%s5255_s2 + $0xf0] sm:$0xff]  ;;  %v52_v2 = vld [vmem:[%s5255_s2 + $0xe8] sm:$0xff]  ;;  %163 = vmatprep.mubr.f32.mxu0 %v5275_v3  ;;  %399 = vmatprep.mubr.f32.mxu1 %v5275_v3  ;;  %p2755_p0 = scmp.le.s32.totalorder %s5254_s0, 0 }
   0x2   :  { %v3237_v4 = vand.u32 4294901760, %v54_v0  ;;  %v3239_v5 = vand.u32 4294901760, %v53_v1  ;;  %v3241_v6 = vand.u32 4294901760, %v52_v2  ;;  %v51_v7 = vld [vmem:[%s5255_s2 + $0xe0] sm:$0xff]  ;;  %v50_v8 = vld [vmem:[%s5255_s2 + $0xd8] sm:$0xff]  ;;  %v49_v9 = vld [vmem:[%s5255_s2 + $0xd0] sm:$0xff] }
   0x3   :  { %v3252_v10 = vand.u32 4294901760, %v51_v7  ;;  %v3254_v11 = vand.u32 4294901760, %v50_v8  ;;  %v3256_v12 = vand.u32 4294901760, %v49_v9  ;;  %v48_v13 = vld [vmem:[%s5255_s2 + $0xc8] sm:$0xff]  ;;  %v47_v14 = vld [vmem:[%s5255_s2 + $0xc0] sm:$0xff]  ;;  %v46_v15 = vld [vmem:[%s5255_s2 + $0xb8] sm:$0xff] }
   0x4   :  { %68 = vmatprep.subr.mxu0 %v3237_v4  ;;  %v3268_v16 = vand.u32 4294901760, %v48_v13  ;;  %v3270_v17 = vand.u32 4294901760, %v47_v14  ;;  %v3272_v18 = vand.u32 4294901760, %v46_v15  ;;  %v3275_v19 = vsub.f32 %v54_v0, %v3237_v4  ;;  %v3280_v20 = vld [vmem:[%s5255_s2 + $0xb0] sm:$0xff]  ;;  %v3285_v21 = vld [vmem:[%s5255_s2 + $0xa8] sm:$0xff]  ;;  %v3290_v22 = vld [vmem:[%s5255_s2 + $0xa0] sm:$0xff] }
   0x5   :  { %70 = vmatpush1.msra.mxu0 %v3239_v5  ;;  %v3294_v23 = vand.u32 4294901760, %v3280_v20  ;;  %v3297_v24 = vsub.f32 %v53_v1, %v3239_v5  ;;  %v3300_v25 = vand.u32 4294901760, %v3285_v21  ;;  %v3303_v26 = vsub.f32 %v52_v2, %v3241_v6  ;;  %v3308_v27 = vld [vmem:[%s5255_s2 + $0x98] sm:$0xff]  ;;  %v3313_v28 = vld [vmem:[%s5255_s2 + $0x90] sm:$0xff]  ;;  %v3318_v29 = vld [vmem:[%s5255_s2 + $0x88] sm:$0xff] }
   0x6   :  { %72 = vmatprep.subr.mxu0 %v3241_v6  ;;  %v5274_v30 = vand.u32 4294901760, %v3275_v19  ;;  %v3323_v31 = vand.u32 4294901760, %v3290_v22  ;;  %v3326_v32 = vsub.f32 %v51_v7, %v3252_v10  ;;  %v3329_v33 = vand.u32 4294901760, %v3308_v27  ;;  %v3343_v38 = vld [vmem:[%s5255_s2 + $0x80] sm:$0xff]  ;;  %v3370_v47 = vld [vmem:[%s5255_s2 + $0x78] sm:$0xff]  ;;  %v3383_v52 = vld [vmem:[%s5255_s2 + $0x70] sm:$0xff] }
   0x7   :  { %74 = vmatpush1.msra.mxu0 %v3252_v10  ;;  %v5272_v34 = vand.u32 4294901760, %v3297_v24  ;;  %v5271_v35 = vand.u32 4294901760, %v3303_v26  ;;  %v3335_v36 = vsub.f32 %v50_v8, %v3254_v11  ;;  %v3338_v37 = vand.u32 4294901760, %v3313_v28  ;;  %v3393_v57 = vld [vmem:[%s5255_s2 + $0x68] sm:$0xff]  ;;  %v3408_v62 = vld [vmem:[%s5255_s2 + $0x60] sm:$0xff]  ;;  %v3423_v7 = vld [vmem:[%s5255_s2 + $0x58] sm:$0xff] }
   0x8   :  { %5458 = vst [vmem:[#allocation4_spill] sm:$0xff] %v3329_v33  ;;  %76 = vmatprep.subr.mxu0 %v3254_v11  ;;  %v178_v39 = vsub.f32 %v3275_v19, %v5274_v30  ;;  %v5269_v40 = vand.u32 4294901760, %v3326_v32  ;;  %v3351_v41 = vsub.f32 %v49_v9, %v3256_v12  ;;  %v3354_v42 = vand.u32 4294901760, %v3318_v29  ;;  %v3559_v30 = vld [vmem:[%s5255_s2 + $0x18] sm:$0xff] }
   0x9   :  { %5459 = vst [vmem:[#allocation5_spill] sm:$0xff] %v3338_v37  ;;  %78 = vmatpush1.msra.mxu0 %v3256_v12  ;;  %v184_v43 = vsub.f32 %v3297_v24, %v5272_v34  ;;  %v190_v44 = vsub.f32 %v3303_v26, %v5271_v35  ;;  %v5267_v45 = vand.u32 4294901760, %v3335_v36  ;;  %v3365_v46 = vsub.f32 %v48_v13, %v3268_v16 }
   0xa   :  { %5460 = vst [vmem:[#allocation6_spill] sm:$0xff] %v3354_v42  ;;  %80 = vmatprep.subr.mxu0 %v3268_v16  ;;  %v179_v48 = vand.u32 4294901760, %v178_v39  ;;  %v196_v49 = vsub.f32 %v3326_v32, %v5269_v40  ;;  %v5266_v50 = vand.u32 4294901760, %v3351_v41  ;;  %v3378_v51 = vand.u32 4294901760, %v3343_v38  ;;  %v3532_v40 = vld [vmem:[%s5255_s2 + $0x28] sm:$0xff] }
   0xb   :  { %82 = vmatpush1.msra.mxu0 %v3270_v17  ;;  %v185_v53 = vand.u32 4294901760, %v184_v43  ;;  %v191_v54 = vand.u32 4294901760, %v190_v44  ;;  %v202_v55 = vsub.f32 %v3335_v36, %v5267_v45  ;;  %v5264_v56 = vand.u32 4294901760, %v3365_v46  ;;  %v3516_v45 = vld [vmem:[%s5255_s2 + $0x30] sm:$0xff] }
   0xc   :  { %5461 = vst [vmem:[#allocation7_spill] sm:$0xff] %v3378_v51  ;;  %84 = vmatprep.subr.mxu0 %v3272_v18  ;;  %180 = vmatprep.subr.mxu1 %v179_v48  ;;  %v197_v58 = vand.u32 4294901760, %v196_v49  ;;  %v208_v59 = vsub.f32 %v3351_v41, %v5266_v50  ;;  %v3400_v60 = vsub.f32 %v47_v14, %v3270_v17  ;;  %v3403_v61 = vand.u32 4294901760, %v3370_v47 }
   0xd   :  { %86 = vmatpush1.msra.mxu0 %v3294_v23  ;;  %186 = vmatpush1.msra.mxu1 %v185_v53  ;;  %v203_v63 = vand.u32 4294901760, %v202_v55  ;;  %v214_v0 = vsub.f32 %v3365_v46, %v5264_v56  ;;  %v3415_v1 = vsub.f32 %v46_v15, %v3272_v18  ;;  %v3418_v2 = vand.u32 4294901760, %v3383_v52  ;;  %v3437_v15 = vld [vmem:[%s5255_s2 + $0x50] sm:$0xff] }
   0xe   :  { %5462 = vst [vmem:[#allocation8_spill] sm:$0xff] %v3403_v61  ;;  %88 = vmatprep.subr.mxu0 %v3300_v25  ;;  %192 = vmatprep.subr.mxu1 %v191_v54  ;;  %v209_v8 = vand.u32 4294901760, %v208_v59  ;;  %v5262_v9 = vand.u32 4294901760, %v3400_v60  ;;  %v3429_v13 = vsub.f32 %v3280_v20, %v3294_v23  ;;  %v3432_v14 = vand.u32 4294901760, %v3393_v57 }
   0xf   :  { %5463 = vst [vmem:[#allocation9_spill] sm:$0xff] %v3418_v2  ;;  %90 = vmatpush1.msra.mxu0 %v3323_v31  ;;  %198 = vmatpush1.msra.mxu1 %v197_v58  ;;  %v215_v39 = vand.u32 4294901760, %v214_v0  ;;  %v5261_v43 = vand.u32 4294901760, %v3415_v1  ;;  %v3443_v44 = vsub.f32 %v3285_v21, %v3300_v25  ;;  %v3446_v20 = vand.u32 4294901760, %v3408_v62  ;;  %v3463_v21 = vld [vmem:[%s5255_s2 + $0x48] sm:$0xff] }
  0x10   :  { %5464 = vst [vmem:[#allocation10_spill] sm:$0xff] %v3432_v14  ;;  %92 = vmatprep.subr.mxu0 %v3329_v33  ;;  %204 = vmatprep.subr.mxu1 %v203_v63  ;;  %v220_v48 = vsub.f32 %v3400_v60, %v5262_v9  ;;  %v5263_v49 = vand.u32 4294901760, %v3429_v13  ;;  %v3455_v53 = vsub.f32 %v3290_v22, %v3323_v31  ;;  %v3458_v54 = vand.u32 4294901760, %v3423_v7 }
  0x11   :  { %5465 = vst [vmem:[#allocation11_spill] sm:$0xff] %v3446_v20  ;;  %94 = vmatpush1.msra.mxu0 %v3338_v37  ;;  %210 = vmatpush1.msra.mxu1 %v209_v8  ;;  %v226_v55 = vsub.f32 %v3415_v1, %v5261_v43  ;;  %v5265_v58 = vand.u32 4294901760, %v3443_v44  ;;  %v3472_v22 = vsub.f32 %v3308_v27, %v3329_v33  ;;  %v3475_v59 = vand.u32 4294901760, %v3437_v15  ;;  %v3489_v27 = vld [vmem:[%s5255_s2 + $0x40] sm:$0xff] }
  0x12   :  { %5466 = vst [vmem:[#allocation12_spill] sm:$0xff] %v3458_v54  ;;  %96 = vmatprep.subr.mxu0 %v3354_v42  ;;  %216 = vmatprep.subr.mxu1 %v215_v39  ;;  %v221_v63 = vand.u32 4294901760, %v220_v48  ;;  %v232_v0 = vsub.f32 %v3429_v13, %v5263_v49  ;;  %v5268_v8 = vand.u32 4294901760, %v3455_v53  ;;  %v3484_v43 = vsub.f32 %v3313_v28, %v3338_v37  ;;  %v3502_v28 = vld [vmem:[%s5255_s2 + $0x38] sm:$0xff] }
  0x13   :  { %5467 = vst [vmem:[#allocation13_spill] sm:$0xff] %v3475_v59  ;;  %98 = vmatpush1.msra.mxu0 %v3378_v51  ;;  %v227_v9 = vand.u32 4294901760, %v226_v55  ;;  %v238_v39 = vsub.f32 %v3443_v44, %v5265_v58  ;;  %v5270_v48 = vand.u32 4294901760, %v3472_v22  ;;  %v3497_v49 = vand.u32 4294901760, %v3463_v21 }
  0x14   :  { %222 = vmatpush1.msra.mxu1 %v221_v63  ;;  %100 = vmatprep.subr.mxu0 %v3403_v61  ;;  %v233_v56 = vand.u32 4294901760, %v232_v0  ;;  %v244_v55 = vsub.f32 %v3455_v53, %v5268_v8  ;;  %v5273_v58 = vand.u32 4294901760, %v3484_v43  ;;  %v3511_v50 = vsub.f32 %v3318_v29, %v3354_v42 }
  0x15   :  { %5468 = vst [vmem:[#allocation14_spill] sm:$0xff] %v3497_v49  ;;  %228 = vmatprep.subr.mxu1 %v227_v9  ;;  %102 = vmatpush1.msra.mxu0 %v3418_v2  ;;  %v239_v63 = vand.u32 4294901760, %v238_v39  ;;  %v250_v0 = vsub.f32 %v3472_v22, %v5270_v48  ;;  %v3523_v8 = vand.u32 4294901760, %v3489_v27  ;;  %v3527_v29 = vsub.f32 %v3343_v38, %v3378_v51  ;;  %v3545_v38 = vld [vmem:[%s5255_s2 + $0x20] sm:$0xff] }
  0x16   :  { %234 = vmatpush1.msra.mxu1 %v233_v56  ;;  %104 = vmatprep.subr.mxu0 %v3432_v14  ;;  %v245_v9 = vand.u32 4294901760, %v244_v55  ;;  %v256_v39 = vsub.f32 %v3484_v43, %v5273_v58  ;;  %v5279_v48 = vand.u32 4294901760, %v3511_v50  ;;  %v3540_v35 = vand.u32 4294901760, %v3502_v28 }
  0x17   :  { %5469 = vst [vmem:[#allocation15_spill] sm:$0xff] %v3523_v8  ;;  %240 = vmatprep.subr.mxu1 %v239_v63  ;;  %106 = vmatpush1.msra.mxu0 %v3446_v20  ;;  %v251_v56 = vand.u32 4294901760, %v250_v0  ;;  %v5280_v55 = vand.u32 4294901760, %v3527_v29  ;;  %v3551_v34 = vsub.f32 %v3370_v47, %v3403_v61  ;;  %v3554_v58 = vand.u32 4294901760, %v3516_v45 }
  0x18   :  { %246 = vmatpush1.msra.mxu1 %v245_v9  ;;  %108 = vmatprep.subr.mxu0 %v3458_v54  ;;  %v257_v63 = vand.u32 4294901760, %v256_v39  ;;  %v262_v0 = vsub.f32 %v3511_v50, %v5279_v48  ;;  %v3567_v47 = vsub.f32 %v3383_v52, %v3418_v2  ;;  %v3570_v3 = vand.u32 4294901760, %v3532_v40  ;;  %v3587_v52 = vld [vmem:[%s5255_s2 + $0x10] sm:$0xff] }
  0x19   :  { %5470 = vst [vmem:[#allocation16_spill] sm:$0xff] %v3554_v58  ;;  %252 = vmatprep.subr.mxu1 %v251_v56  ;;  %110 = vmatpush1.msra.mxu0 %v3475_v59  ;;  %v268_v9 = vsub.f32 %v3527_v29, %v5280_v55  ;;  %v3579_v61 = vsub.f32 %v3393_v57, %v3432_v14  ;;  %v3582_v48 = vand.u32 4294901760, %v3545_v38  ;;  %v3596_v57 = vand.u32 4294901760, %v3559_v30  ;;  %v3601_v14 = vld [vmem:[%s5255_s2 + $0x8] sm:$0xff] }
  0x1a   :  { %5471 = vst [vmem:[#allocation17_spill] sm:$0xff] %v3570_v3  ;;  %258 = vmatpush1.msra.mxu1 %v257_v63  ;;  %112 = vmatprep.subr.mxu0 %v3497_v49  ;;  %v263_v56 = vand.u32 4294901760, %v262_v0  ;;  %v3593_v39 = vsub.f32 %v3408_v62, %v3446_v20  ;;  %v5473_v2 = vand.u32 4294901760, %v3551_v34  ;;  %v3610_v62 = vsub.f32 %v3423_v7, %v3458_v54  ;;  %v3627_v7 = vld [vmem:[%s5255_s2] sm:$0xff] }
  0x1b   :  { %5472 = vst [vmem:[#allocation18_spill] sm:$0xff] %v3582_v48  ;;  %114 = vmatpush1.msra.mxu0 %v3523_v8  ;;  %v269_v63 = vand.u32 4294901760, %v268_v9  ;;  %v5297_v55 = vand.u32 4294901760, %v3579_v61  ;;  %v5475_v20 = vand.u32 4294901760, %v3567_v47  ;;  %v3618_v9 = vand.u32 4294901760, %v3587_v52 }
  0x1c   :  { %v274_v0 = vsub.f32 %v3551_v34, %v5473_v2  ;;  %5474 = vst [vmem:[#allocation19_spill] sm:$0xff] %v3610_v62  ;;  %264 = vmatprep.subr.mxu1 %v263_v56  ;;  %116 = vmatprep.subr.mxu0 %v3540_v35  ;;  %v3622_v2 = vsub.f32 %v3437_v15, %v3475_v59  ;;  %v3635_v54 = vand.u32 4294901760, %v3601_v14  ;;  %v5477_v59 = vand.u32 4294901760, %v3593_v39 }
  0x1d   :  { %v280_v51 = vsub.f32 %v3567_v47, %v5475_v20  ;;  %5476 = vst [vmem:[#allocation20_spill] sm:$0xff] %v3618_v9  ;;  %270 = vmatpush1.msra.mxu1 %v269_v63  ;;  %118 = vmatpush1.msra.mxu0 %v3554_v58  ;;  %v286_v20 = vsub.f32 %v3579_v61, %v5297_v55  ;;  %v22_v55 = vld [vmem:[%s5259_s1] sm:$0xff] }
  0x1e   :  { %v275_v56 = vand.u32 4294901760, %v274_v0  ;;  %120 = vmatprep.subr.mxu0 %v3570_v3  ;;  %v292_v37 = vsub.f32 %v3593_v39, %v5477_v59  ;;  %v3644_v0 = vsub.f32 %v3463_v21, %v3497_v49  ;;  %v3654_v59 = vand.u32 4294901760, %v3627_v7 }
  0x1f   :  { %v281_v15 = vand.u32 4294901760, %v280_v51  ;;  %v287_v42 = vand.u32 4294901760, %v286_v20  ;;  %122 = vmatpush1.msra.mxu0 %v3582_v48  ;;  %v5478_v51 = vand.u32 4294901760, %v3610_v62  ;;  %v3658_v63 = vsub.f32 %v3489_v27, %v3523_v8 }
  0x20   :  { %276 = vmatprep.subr.mxu1 %v275_v56  ;;  %v293_v21 = vand.u32 4294901760, %v292_v37  ;;  %124 = vmatprep.subr.mxu0 %v3596_v57  ;;  %v5479_v56 = vand.u32 4294901760, %v3622_v2  ;;  %v5304_v49 = vand.u32 4294901760, %v3644_v0  ;;  %v3675_v37 = vsub.f32 %v3516_v45, %v3554_v58 }
  0x21   :  { %v298_v33 = vsub.f32 %v3610_v62, %v5478_v51  ;;  %282 = vmatpush1.msra.mxu1 %v281_v15  ;;  %v3667_v51 = vsub.f32 %v3502_v28, %v3540_v35  ;;  %126 = vmatpush1.msra.mxu0 %v3618_v9  ;;  %v5307_v27 = vand.u32 4294901760, %v3658_v63  ;;  %v3671_v15 = vand.u32 4294901760, %v22_v55 }
  0x22   :  { %v304_v20 = vsub.f32 %v3622_v2, %v5479_v56  ;;  %288 = vmatprep.subr.mxu1 %v287_v42  ;;  %128 = vmatprep.subr.mxu0 %v3635_v54  ;;  %v310_v28 = vsub.f32 %v3644_v0, %v5304_v49  ;;  %v3684_v42 = vsub.f32 %v3532_v40, %v3570_v3 }
  0x23   :  { %v299_v62 = vand.u32 4294901760, %v298_v33  ;;  %5480 = vst [vmem:[#allocation21_spill] sm:$0xff] %v3671_v15  ;;  %294 = vmatpush1.msra.mxu1 %v293_v21  ;;  %130 = vmatpush1.msra.mxu0 %v3654_v59  ;;  %v316_v45 = vsub.f32 %v3658_v63, %v5307_v27  ;;  %v3691_v21 = vsub.f32 %v22_v55, %v3671_v15  ;;  %v5481_v40 = vand.u32 4294901760, %v3667_v51 }
  0x24   :  { %v305_v56 = vand.u32 4294901760, %v304_v20  ;;  %v3696_v49 = vsub.f32 %v3545_v38, %v3582_v48  ;;  %v311_v33 = vand.u32 4294901760, %v310_v28  ;;  %409 = vmatprep.subr.mxu0 %v3275_v19  ;;  %v5312_v3 = vand.u32 4294901760, %v3684_v42 }
  0x25   :  { %300 = vmatprep.subr.mxu1 %v299_v62  ;;  %v322_v62 = vsub.f32 %v3667_v51, %v5481_v40  ;;  %v3705_v55 = vsub.f32 %v3559_v30, %v3596_v57  ;;  %v317_v27 = vand.u32 4294901760, %v316_v45  ;;  %v5313_v20 = vand.u32 4294901760, %v3691_v21 }
  0x26   :  { %306 = vmatpush1.msra.mxu1 %v305_v56  ;;  %v5482_v38 = vand.u32 4294901760, %v3675_v37  ;;  %v5316_v28 = vand.u32 4294901760, %v3696_v49  ;;  %v334_v40 = vsub.f32 %v3684_v42, %v5312_v3  ;;  %v3718_v30 = vsub.f32 %v3587_v52, %v3618_v9 }
  0x27   :  { %312 = vmatprep.subr.mxu1 %v311_v33  ;;  %v323_v48 = vand.u32 4294901760, %v322_v62  ;;  %v5320_v58 = vand.u32 4294901760, %v3705_v55  ;;  %v167_v45 = vsub.f32 %v3691_v21, %v5313_v20  ;;  %v3728_v62 = vsub.f32 %v3601_v14, %v3635_v54 }
  0x28   :  { %v328_v56 = vsub.f32 %v3675_v37, %v5482_v38  ;;  %5483 = vst [vmem:[#allocation22_spill] sm:$0xff] %v3718_v30  ;;  %318 = vmatpush1.msra.mxu1 %v317_v27  ;;  %v340_v33 = vsub.f32 %v3696_v49, %v5316_v28  ;;  %v335_v3 = vand.u32 4294901760, %v334_v40  ;;  %v5319_v27 = vand.u32 4294901760, %v3718_v30 }
  0x29   :  { %324 = vmatprep.subr.mxu1 %v323_v48  ;;  %v346_v52 = vsub.f32 %v3705_v55, %v5320_v58  ;;  %v3736_v20 = vsub.f32 %v3627_v7, %v3654_v59  ;;  %v5318_v28 = vand.u32 4294901760, %v3728_v62  ;;  %v5498_v58 = vand.u32 4294901760, %v3275_v19 }
  0x2a   :  { %v329_v38 = vand.u32 4294901760, %v328_v56  ;;  %v168_v56 = vand.u32 4294901760, %v167_v45  ;;  %v341_v9 = vand.u32 4294901760, %v340_v33  ;;  %v352_v48 = vsub.f32 %v3718_v30, %v5319_v27  ;;  %v5497_v27 = vld [vmem:[#allocation14_spill] sm:$0xff] }
  0x2b   :  { %5484 = vst [vmem:[#allocation23_spill] sm:$0xff] %v3736_v20  ;;  %v347_v14 = vand.u32 4294901760, %v346_v52  ;;  %v5317_v40 = vand.u32 4294901760, %v3736_v20  ;;  %v358_v7 = vsub.f32 %v3728_v62, %v5318_v28  ;;  %v5485_v33 = vmov 0.0   ;;  %v5486_v52 = vld [vmem:[#allocation4_spill] sm:$0xff]  ;;  %v5496_v28 = vld [vmem:[#allocation13_spill] sm:$0xff] }
  0x2c   :  { %330 = vmatpush1.msra.mxu1 %v329_v38  ;;  %169 = vmatmul.mubr.f32.vlgmr.msra.gmra.mxu0 %v168_v56  ;;  %v353_v45 = vand.u32 4294901760, %v352_v48  ;;  %v5487_v56 = vld [vmem:[#allocation19_spill] sm:$0xff]  ;;  %v5489_v48 = vld [vmem:[#allocation6_spill] sm:$0xff]  ;;  %v5505_v19 = vand.u32 4294901760, %v3335_v36 }
  0x2d   :  { %336 = vmatprep.subr.mxu1 %v335_v3  ;;  %412 = vmatpush1.msra.mxu0 %v3297_v24  ;;  %v364_v3 = vsub.f32 %v3736_v20, %v5317_v40  ;;  %v359_v38 = vand.u32 4294901760, %v358_v7  ;;  %v5490_v7 = vld [vmem:[#allocation7_spill] sm:$0xff]  ;;  %v5495_v40 = vld [vmem:[#allocation12_spill] sm:$0xff] }
  0x2e   :  { %342 = vmatpush1.msra.mxu1 %v341_v9  ;;  %415 = vmatprep.subr.mxu0 %v3303_v26 }
  0x2f   :  { %348 = vmatprep.subr.mxu1 %v347_v14  ;;  %535 = vmatprep.mubr.f32.mxu0 %v5485_v33  ;;  %v365_v9 = vand.u32 4294901760, %v364_v3  ;;  %v5488_v14 = vld [vmem:[#allocation5_spill] sm:$0xff] }
  0x30   :  { %418 = vmatpush1.msra.mxu0 %v3326_v32  ;;  %354 = vmatpush1.msra.mxu1 %v353_v45  ;;  %v5491_v45 = vld [vmem:[#allocation8_spill] sm:$0xff]  ;;  %v5492_v3 = vld [vmem:[#allocation9_spill] sm:$0xff] }
  0x31   :  { %421 = vmatprep.subr.mxu0 %v3335_v36  ;;  %360 = vmatprep.subr.mxu1 %v359_v38  ;;  %v5493_v38 = vld [vmem:[#allocation10_spill] sm:$0xff]  ;;  %v5510_v36 = vand.u32 4294901760, %v3691_v21 }
  0x32   :  { %424 = vmatpush1.msra.mxu0 %v3351_v41  ;;  %366 = vmatpush1.msra.mxu1 %v365_v9  ;;  %v5494_v9 = vld [vmem:[#allocation11_spill] sm:$0xff] }
  0x33   :  { %427 = vmatprep.subr.mxu0 %v3365_v46  ;;  %401 = vmatmul.mubr.f32.vlgmr.msra.gmra.mxu1 %v3671_v15  ;;  %v5499_v15 = vld [vmem:[#allocation16_spill] sm:$0xff] }
  0x34   :  { %430 = vmatpush1.msra.mxu0 %v3400_v60  ;;  %545 = vmatprep.subr.mxu1 %v3237_v4 }
  0x35   :  { %433 = vmatprep.subr.mxu0 %v3415_v1  ;;  %547 = vmatpush1.msra.mxu1 %v3239_v5 }
  0x36   :  { %436 = vmatpush1.msra.mxu0 %v3429_v13  ;;  %549 = vmatprep.subr.mxu1 %v3241_v6 }
  0x37   :  { %439 = vmatprep.subr.mxu0 %v3443_v44  ;;  %551 = vmatpush1.msra.mxu1 %v3252_v10 }
  0x38   :  { %442 = vmatpush1.msra.mxu0 %v3455_v53  ;;  %553 = vmatprep.subr.mxu1 %v3254_v11 }
  0x39   :  { %445 = vmatprep.subr.mxu0 %v3472_v22  ;;  %555 = vmatpush1.msra.mxu1 %v3256_v12 }
  0x3a   :  { %448 = vmatpush1.msra.mxu0 %v3484_v43  ;;  %557 = vmatprep.subr.mxu1 %v3268_v16 }
  0x3b   :  { %451 = vmatprep.subr.mxu0 %v3511_v50  ;;  %559 = vmatpush1.msra.mxu1 %v3270_v17 }
  0x3c   :  { %454 = vmatpush1.msra.mxu0 %v3527_v29  ;;  %561 = vmatprep.subr.mxu1 %v3272_v18 }
  0x3d   :  { %457 = vmatprep.subr.mxu0 %v3551_v34  ;;  %563 = vmatpush1.msra.mxu1 %v3294_v23 }
  0x3e   :  { %460 = vmatpush1.msra.mxu0 %v3567_v47  ;;  %565 = vmatprep.subr.mxu1 %v3300_v25 }
  0x3f   :  { %463 = vmatprep.subr.mxu0 %v3579_v61  ;;  %567 = vmatpush1.msra.mxu1 %v3323_v31 }
  0x40   :  { %466 = vmatpush1.msra.mxu0 %v3593_v39  ;;  %569 = vmatprep.subr.mxu1 %v5486_v52 }
  0x41   :  { %469 = vmatprep.subr.mxu0 %v5487_v56  ;;  %571 = vmatpush1.msra.mxu1 %v5488_v14 }
  0x42   :  { %472 = vmatpush1.msra.mxu0 %v3622_v2  ;;  %573 = vmatprep.subr.mxu1 %v5489_v48 }
  0x43   :  { %475 = vmatprep.subr.mxu0 %v3644_v0  ;;  %575 = vmatpush1.msra.mxu1 %v5490_v7 }
  0x44   :  { %478 = vmatpush1.msra.mxu0 %v3658_v63  ;;  %577 = vmatprep.subr.mxu1 %v5491_v45 }
  0x45   :  { %481 = vmatprep.subr.mxu0 %v3667_v51  ;;  %579 = vmatpush1.msra.mxu1 %v5492_v3 }
  0x46   :  { %484 = vmatpush1.msra.mxu0 %v3675_v37  ;;  %581 = vmatprep.subr.mxu1 %v5493_v38 }
  0x47   :  { %487 = vmatprep.subr.mxu0 %v3684_v42  ;;  %583 = vmatpush1.msra.mxu1 %v5494_v9 }
  0x48   :  { %490 = vmatpush1.msra.mxu0 %v3696_v49  ;;  %585 = vmatprep.subr.mxu1 %v5495_v40 }
  0x49   :  { %493 = vmatprep.subr.mxu0 %v3705_v55  ;;  %587 = vmatpush1.msra.mxu1 %v5496_v28  ;;  %v5500_v28 = vand.u32 4294901760, %v3297_v24  ;;  %v5507_v24 = vand.u32 4294901760, %v3351_v41  ;;  %v5512_v41 = vand.u32 4294901760, %v3429_v13  ;;  %v5531_v13 = vand.u32 4294901760, %v3705_v55 }
  0x4a   :  { %496 = vmatpush1.msra.mxu0 %v3718_v30  ;;  %589 = vmatprep.subr.mxu1 %v5497_v27  ;;  %v5501_v30 = vld [vmem:[#allocation17_spill] sm:$0xff]  ;;  %v5502_v27 = vand.u32 4294901760, %v3303_v26  ;;  %v5508_v26 = vand.u32 4294901760, %v3365_v46  ;;  %v5513_v46 = vand.u32 4294901760, %v3443_v44 }
  0x4b   :  { %499 = vmatprep.subr.mxu0 %v3728_v62  ;;  %591 = vmatpush1.msra.mxu1 %v3523_v8  ;;  %v5503_v8 = vld [vmem:[#allocation18_spill] sm:$0xff] }
  0x4c   :  { %502 = vmatpush1.msra.mxu0 %v3736_v20  ;;  %593 = vmatprep.subr.mxu1 %v3540_v35  ;;  %v5504_v20 = vand.u32 4294901760, %v3326_v32  ;;  %v5509_v32 = vand.u32 4294901760, %v3400_v60  ;;  %v5514_v60 = vand.u32 4294901760, %v3455_v53  ;;  %v5534_v53 = vld [vmem:[#allocation13_spill] sm:$0xff] }
  0x4d   :  { %538 = vmatmul.mubr.f32.vlgmr.msra.gmra.mxu0 %v3691_v21  ;;  %653 = vmatprep.subr.mxu0 %v5498_v58  ;;  %v5506_v58 = vld [vmem:[#allocation20_spill] sm:$0xff] }
  0x4e   :  { %595 = vmatpush1.msra.mxu1 %v5499_v15  ;;  %657 = vmatpush1.msra.mxu0 %v5500_v28 }
  0x4f   :  { %597 = vmatprep.subr.mxu1 %v5501_v30  ;;  %661 = vmatprep.subr.mxu0 %v5502_v27 }
  0x50   :  { %599 = vmatpush1.msra.mxu1 %v5503_v8  ;;  %665 = vmatpush1.msra.mxu0 %v5504_v20  ;;  %v5511_v20 = vand.u32 4294901760, %v3415_v1  ;;  %v5515_v1 = vand.u32 4294901760, %v3472_v22  ;;  %v5535_v22 = vand.u32 4294901760, %v3728_v62 }
  0x51   :  { %601 = vmatprep.subr.mxu1 %v3596_v57  ;;  %669 = vmatprep.subr.mxu0 %v5505_v19 }
  0x52   :  { %603 = vmatpush1.msra.mxu1 %v5506_v58  ;;  %673 = vmatpush1.msra.mxu0 %v5507_v24 }
  0x53   :  { %605 = vmatprep.subr.mxu1 %v3635_v54  ;;  %677 = vmatprep.subr.mxu0 %v5508_v26 }
  0x54   :  { %607 = vmatpush1.msra.mxu1 %v3654_v59  ;;  %640 = vmatprep.mubr.f32.mxu1 %v5485_v33 }
  0x55   :  { %681 = vmatpush1.msra.mxu0 %v5509_v32  ;;  %644 = vmatmul.mubr.f32.vlgmr.msra.gmra.mxu1 %v5510_v36 }
  0x56   :  { %685 = vmatprep.subr.mxu0 %v5511_v20  ;;  %819 = vmatprep.subr.mxu1 %v3237_v4  ;;  %v5516_v4 = vand.u32 4294901760, %v3484_v43  ;;  %v5532_v43 = vld [vmem:[#allocation22_spill] sm:$0xff] }
  0x57   :  { %689 = vmatpush1.msra.mxu0 %v5512_v41  ;;  %821 = vmatpush1.msra.mxu1 %v3239_v5  ;;  %v5517_v5 = vand.u32 4294901760, %v3511_v50  ;;  %v5529_v50 = vand.u32 4294901760, %v3684_v42  ;;  %v5533_v44 = vand.u32 4294901760, %v5532_v43 }
  0x58   :  { %693 = vmatprep.subr.mxu0 %v5513_v46  ;;  %823 = vmatprep.subr.mxu1 %v3241_v6  ;;  %v5518_v6 = vand.u32 4294901760, %v3527_v29  ;;  %v5536_v29 = vld [vmem:[#allocation14_spill] sm:$0xff] }
  0x59   :  { %697 = vmatpush1.msra.mxu0 %v5514_v60  ;;  %825 = vmatpush1.msra.mxu1 %v3252_v10  ;;  %v5519_v10 = vand.u32 4294901760, %v3551_v34  ;;  %v5528_v34 = vand.u32 4294901760, %v3675_v37 }
  0x5a   :  { %701 = vmatprep.subr.mxu0 %v5515_v1  ;;  %827 = vmatprep.subr.mxu1 %v3254_v11  ;;  %v5520_v11 = vand.u32 4294901760, %v3567_v47  ;;  %v5537_v47 = vld [vmem:[#allocation23_spill] sm:$0xff] }
  0x5b   :  { %705 = vmatpush1.msra.mxu0 %v5516_v4  ;;  %829 = vmatpush1.msra.mxu1 %v3256_v12  ;;  %v5521_v12 = vand.u32 4294901760, %v3579_v61  ;;  %v5530_v61 = vand.u32 4294901760, %v3696_v49  ;;  %v5538_v49 = vand.u32 4294901760, %v5537_v47 }
  0x5c   :  { %709 = vmatprep.subr.mxu0 %v5517_v5  ;;  %831 = vmatprep.subr.mxu1 %v3268_v16  ;;  %v5522_v16 = vand.u32 4294901760, %v3593_v39  ;;  %v5539_v39 = vld [vmem:[#allocation15_spill] sm:$0xff] }
  0x5d   :  { %713 = vmatpush1.msra.mxu0 %v5518_v6  ;;  %833 = vmatpush1.msra.mxu1 %v3270_v17  ;;  %v5523_v17 = vand.u32 4294901760, %v5487_v56 }
  0x5e   :  { %717 = vmatprep.subr.mxu0 %v5519_v10  ;;  %835 = vmatprep.subr.mxu1 %v3272_v18  ;;  %v5524_v18 = vand.u32 4294901760, %v3622_v2  ;;  %v5540_v2 = vld [vmem:[#allocation21_spill] sm:$0xff] }
  0x5f   :  { %721 = vmatpush1.msra.mxu0 %v5520_v11  ;;  %837 = vmatpush1.msra.mxu1 %v3294_v23  ;;  %v5525_v23 = vand.u32 4294901760, %v3644_v0 }
  0x60   :  { %725 = vmatprep.subr.mxu0 %v5521_v12  ;;  %839 = vmatprep.subr.mxu1 %v3300_v25  ;;  %v5526_v25 = vand.u32 4294901760, %v3658_v63  ;;  %v57_v63 = vlaneseq }
  0x61   :  { %729 = vmatpush1.msra.mxu0 %v5522_v16  ;;  %841 = vmatpush1.msra.mxu1 %v3323_v31  ;;  %v5527_v31 = vand.u32 4294901760, %v3667_v51  ;;  %v55_v51 = vld [vmem:[%s5260_s3] sm:$0x3] }
  0x62   :  { %733 = vmatprep.subr.mxu0 %v5523_v17  ;;  %843 = vmatprep.subr.mxu1 %v5486_v52 }
  0x63   :  { %737 = vmatpush1.msra.mxu0 %v5524_v18  ;;  %845 = vmatpush1.msra.mxu1 %v5488_v14 }
  0x64   :  { %741 = vmatprep.subr.mxu0 %v5525_v23  ;;  %847 = vmatprep.subr.mxu1 %v5489_v48 }
  0x65   :  { %745 = vmatpush1.msra.mxu0 %v5526_v25  ;;  %849 = vmatpush1.msra.mxu1 %v5490_v7 }
  0x66   :  { %749 = vmatprep.subr.mxu0 %v5527_v31  ;;  %851 = vmatprep.subr.mxu1 %v5491_v45 }
  0x67   :  { %753 = vmatpush1.msra.mxu0 %v5528_v34  ;;  %853 = vmatpush1.msra.mxu1 %v5492_v3 }
  0x68   :  { %757 = vmatprep.subr.mxu0 %v5529_v50  ;;  %855 = vmatprep.subr.mxu1 %v5493_v38 }
  0x69   :  { %761 = vmatpush1.msra.mxu0 %v5530_v61  ;;  %857 = vmatpush1.msra.mxu1 %v5494_v9 }
  0x6a   :  { %765 = vmatprep.subr.mxu0 %v5531_v13  ;;  %859 = vmatprep.subr.mxu1 %v5495_v40 }
  0x6b   :  { %769 = vmatpush1.msra.mxu0 %v5533_v44  ;;  %861 = vmatpush1.msra.mxu1 %v5534_v53 }
  0x6c   :  { %773 = vmatprep.subr.mxu0 %v5535_v22  ;;  %863 = vmatprep.subr.mxu1 %v5536_v29 }
  0x6d   :  { %777 = vmatpush1.msra.mxu0 %v5538_v49  ;;  %810 = vmatprep.mubr.f32.mxu0 %v5485_v33 }
  0x6e   :  { %865 = vmatpush1.msra.mxu1 %v5539_v39  ;;  %812 = vmatmul.mubr.f32.vlgmr.msra.gmra.mxu0 %v5540_v2 }
  0x6f   :  { %867 = vmatprep.subr.mxu1 %v3540_v35  ;;  %914 = vmatprep.mubr.f32.mxu1 %v5485_v33  ;;  %v58_v35 = vshrl.u32 %v57_v63, 7 }
  0x70   :  { %869 = vmatpush1.msra.mxu1 %v5499_v15 }
  0x71   :  { %871 = vmatprep.subr.mxu1 %v5501_v30  ;;  %v59_v0 = vsub.s32 0, %v58_v35  ;;  %v63_v37 = vsub.s32 1, %v58_v35 }
  0x72   :  { %873 = vmatpush1.msra.mxu1 %v5503_v8 }
  0x73   :  { %875 = vmatprep.subr.mxu1 %v3596_v57  ;;  %v60_v8 = vrot.slane %v55_v51, %v59_v0  ;;  %v64_v21 = vrot.slane %v55_v51, %v63_v37 }
  0x74   :  { %877 = vmatpush1.msra.mxu1 %v5506_v58 }
  0x75   :  { %879 = vmatprep.subr.mxu1 %v3635_v54 }
  0x76   :  { %881 = vmatpush1.msra.mxu1 %v3654_v59 }
  0x77   :  { %916 = vmatmul.mubr.f32.vlgmr.msra.gmra.mxu1 %v5540_v2 }
  0xec   :  { %v170_v15 = vpop.f32.mrf.mxu0 }
  0xed   :  { %v171_v28 = vadd.f32 %v170_v15, %v60_v8 }
  0xee   :  { %v172_v42 = vpop.f32.mrf.mxu0 }
  0xef   :  { %v173_v30 = vadd.f32 %v172_v42, %v64_v21 }
  0xf3   :  { %v402_v57 = vpop.f32.mrf.mxu1 }
  0xf4   :  { %v403_v27 = vadd.f32 %v402_v57, %v171_v28 }
  0xf5   :  { %v404_v54 = vpop.f32.mrf.mxu1 }
  0xf6   :  { %v405_v33 = vadd.f32 %v404_v54, %v173_v30 }
 0x10d   :  { %v539_v55 = vpop.f32.mrf.mxu0 }
 0x10e   :  { %v540_v52 = vadd.f32 %v539_v55, %v403_v27 }
 0x10f   :  { %v541_v59 = vpop.f32.mrf.mxu0 }
 0x110   :  { %v542_v14 = vadd.f32 %v541_v59, %v405_v33 }
 0x115   :  { %v645_v62 = vpop.f32.mrf.mxu1 }
 0x116   :  { %v646_v48 = vadd.f32 %v645_v62, %v540_v52 }
 0x117   :  { %v647_v56 = vpop.f32.mrf.mxu1 }
 0x118   :  { %v648_v45 = vadd.f32 %v647_v56, %v542_v14 }
 0x12e   :  { %v813_v40 = vpop.f32.mrf.mxu0 }
 0x12f   :  { %v814_v3 = vadd.f32 %v813_v40, %v646_v48 }
 0x130   :  { %v815_v7 = vpop.f32.mrf.mxu0 }
 0x131   :  { %v816_v9 = vadd.f32 %v815_v7, %v648_v45 }
 0x137   :  { %v917_v38 = vpop.f32.mrf.mxu1 }
 0x138   :  { %v3921_v19 = vadd.f32 %v917_v38, %v814_v3  ;;  %926 = sbr.rel (%p2755_p0) target bundleno = 635 (0x27b), region = 25 }
 0x139   :  { %v919_v58 = vpop.f32.mrf.mxu1 }
 0x13a   :  { %5541 = vst [vmem:[#allocation4_spill] sm:$0xff] %v3921_v19  ;;  %v3923_v24 = vadd.f32 %v919_v58, %v816_v9 }
 0x13c   :  { %5542 = vst [vmem:[#allocation19_spill] sm:$0xff] %v3923_v24 }
 0x13d   :  { %v960_v26 = vld [vmem:[%s5256_s4 + $0xf8] sm:$0xff]  ;;  %v959_v36 = vld [vmem:[%s5256_s4 + $0xf0] sm:$0xff]  ;;  %v958_v5 = vld [vmem:[%s5256_s4 + $0xe8] sm:$0xff]  ;;  %vm1830_vm0 = vcmask 523264  }
 0x13e   :  { %v944_v32 = vld [vmem:[%s5256_s4 + $0x78] sm:$0xff]  ;;  %v3939_v46 = vand.u32 4294901760, %v960_v26  ;;  %v3943_v1 = vand.u32 4294901760, %v959_v36  ;;  %v943_v4 = vld [vmem:[%s5256_s4 + $0x70] sm:$0xff]  ;;  %v942_v6 = vld [vmem:[%s5256_s4 + $0x68] sm:$0xff]  ;;  %v3956_v11 = vand.u32 4294901760, %v958_v5 }
 0x13f   :  { %v3941_v60 = vand.u32 4294901760, %v944_v32  ;;  %v3954_v10 = vand.u32 4294901760, %v943_v4  ;;  %v3958_v12 = vand.u32 4294901760, %v942_v6  ;;  %v957_v16 = vld [vmem:[%s5256_s4 + $0xe0] sm:$0xff]  ;;  %v956_v18 = vld [vmem:[%s5256_s4 + $0xd8] sm:$0xff]  ;;  %v3987_v61 = vld [vmem:[%s5256_s4 + $0xd0] sm:$0xff] }
 0x140   :  { %v941_v17 = vld [vmem:[%s5256_s4 + $0x60] sm:$0xff]  ;;  %2761 = vmatprep.subr.mxu0 %v3939_v46  ;;  %v3970_v23 = vand.u32 4294901760, %v957_v16  ;;  %v3974_v31 = vand.u32 4294901760, %v956_v18  ;;  %v3977_v34 = vsub.f32 %v960_v26, %v3939_v46  ;;  %v3982_v50 = vld [vmem:[%s5256_s4 + $0x58] sm:$0xff]  ;;  %v3992_v13 = vld [vmem:[%s5256_s4 + $0x50] sm:$0xff]  ;;  %v4002_v53 = vand.u32 4294901760, %v3987_v61 }
 0x141   :  { %v3972_v25 = vand.u32 4294901760, %v941_v17  ;;  %2762 = vmatpush3.msra.mxu0 %v3941_v60  ;;  %v3996_v43 = vand.u32 4294901760, %v3982_v50  ;;  %v3999_v44 = vsub.f32 %v944_v32, %v3941_v60  ;;  %v4005_v22 = vsub.f32 %v959_v36, %v3943_v1  ;;  %v4010_v29 = vld [vmem:[%s5256_s4 + $0xc8] sm:$0xff]  ;;  %v4020_v49 = vld [vmem:[%s5256_s4 + $0xc0] sm:$0xff]  ;;  %v4072_v62 = vld [vmem:[%s5256_s4 + $0xb8] sm:$0xff] }
 0x142   :  { %5543 = vst [vmem:[#allocation24_spill] sm:$0xff] %v4002_v53  ;;  %v4015_v47 = vld [vmem:[%s5256_s4 + $0x48] sm:$0xff]  ;;  %2763 = vmatprep.subr.mxu0 %v3943_v1  ;;  %v5337_v39 = vand.u32 4294901760, %v3977_v34  ;;  %v4025_v2 = vand.u32 4294901760, %v3992_v13  ;;  %v4028_v63 = vsub.f32 %v943_v4, %v3954_v10  ;;  %v4031_v35 = vand.u32 4294901760, %v4010_v29  ;;  %v4045_v8 = vld [vmem:[%s5256_s4 + $0x40] sm:$0xff] }
 0x143   :  { %2764 = vmatpush3.msra.mxu0 %v3954_v10  ;;  %v5335_v0 = vand.u32 4294901760, %v3999_v44  ;;  %v5334_v51 = vand.u32 4294901760, %v4005_v22  ;;  %v4037_v15 = vsub.f32 %v958_v5, %v3956_v11  ;;  %v4040_v37 = vand.u32 4294901760, %v4015_v47  ;;  %v4085_v56 = vld [vmem:[%s5256_s4 + $0x38] sm:$0xff]  ;;  %v4095_v3 = vld [vmem:[%s5256_s4 + $0xb0] sm:$0xff] }
 0x144   :  { %5544 = vst [vmem:[#allocation25_spill] sm:$0xff] %v4025_v2  ;;  %5545 = vst [vmem:[#allocation26_spill] sm:$0xff] %v4031_v35  ;;  %2765 = vmatprep.subr.mxu0 %v3956_v11  ;;  %v1196_v42 = vsub.f32 %v3977_v34, %v5337_v39  ;;  %v5332_v57 = vand.u32 4294901760, %v4028_v63  ;;  %v4053_v21 = vsub.f32 %v942_v6, %v3958_v12  ;;  %v4056_v55 = vand.u32 4294901760, %v4020_v49  ;;  %v4110_v32 = vld [vmem:[%s5256_s4 + $0x30] sm:$0xff] }
 0x145   :  { %5546 = vst [vmem:[#allocation27_spill] sm:$0xff] %v4040_v37  ;;  %2766 = vmatpush3.msra.mxu0 %v3958_v12  ;;  %v1084_v28 = vsub.f32 %v3999_v44, %v5335_v0  ;;  %v1203_v54 = vsub.f32 %v4005_v22, %v5334_v51  ;;  %v5330_v30 = vand.u32 4294901760, %v4037_v15  ;;  %v4067_v59 = vsub.f32 %v957_v16, %v3970_v23  ;;  %v4125_v16 = vld [vmem:[%s5256_s4 + $0xa8] sm:$0xff]  ;;  %v4218_v0 = vld [vmem:[%s5256_s4 + $0x18] sm:$0xff]  ;;  %v4234_v39 = vld [vmem:[%s5256_s4 + $0x90] sm:$0xff] }
 0x146   :  { %5547 = vst [vmem:[#allocation28_spill] sm:$0xff] %v4056_v55  ;;  %2767 = vmatprep.subr.mxu0 %v3970_v23  ;;  %v1197_v27 = vand.u32 4294901760, %v1196_v42  ;;  %v1091_v40 = vsub.f32 %v4028_v63, %v5332_v57  ;;  %v5328_v33 = vand.u32 4294901760, %v4053_v21  ;;  %v4080_v52 = vand.u32 4294901760, %v4045_v8 }
 0x147   :  { %2768 = vmatpush3.msra.mxu0 %v3972_v25  ;;  %v1085_v14 = vand.u32 4294901760, %v1084_v28  ;;  %v1204_v48 = vand.u32 4294901760, %v1203_v54  ;;  %v1210_v7 = vsub.f32 %v4037_v15, %v5330_v30  ;;  %v5327_v45 = vand.u32 4294901760, %v4067_v59  ;;  %v4139_v54 = vld [vmem:[%s5256_s4 + $0x28] sm:$0xff] }
 0x148   :  { %5548 = vst [vmem:[#allocation29_spill] sm:$0xff] %v4080_v52  ;;  %2769 = vmatprep.subr.mxu0 %v3974_v31  ;;  %2796 = vmatprep.subr.mxu1 %v1197_v27  ;;  %v1092_v38 = vand.u32 4294901760, %v1091_v40  ;;  %v1098_v9 = vsub.f32 %v4053_v21, %v5328_v33  ;;  %v4102_v58 = vsub.f32 %v941_v17, %v3972_v25  ;;  %v4105_v26 = vand.u32 4294901760, %v4072_v62 }
 0x149   :  { %2770 = vmatpush3.msra.mxu0 %v3996_v43  ;;  %2797 = vmatpush3.msra.mxu1 %v1085_v14  ;;  %v1211_v36 = vand.u32 4294901760, %v1210_v7  ;;  %v1217_v4 = vsub.f32 %v4067_v59, %v5327_v45  ;;  %v4117_v5 = vsub.f32 %v956_v18, %v3974_v31  ;;  %v4120_v6 = vand.u32 4294901760, %v4085_v56 }
 0x14a   :  { %5549 = vst [vmem:[#allocation30_spill] sm:$0xff] %v4105_v26  ;;  %2771 = vmatprep.subr.mxu0 %v4002_v53  ;;  %2798 = vmatprep.subr.mxu1 %v1204_v48  ;;  %v1099_v17 = vand.u32 4294901760, %v1098_v9  ;;  %v5326_v42 = vand.u32 4294901760, %v4102_v58  ;;  %v4131_v28 = vsub.f32 %v3982_v50, %v3996_v43  ;;  %v4134_v18 = vand.u32 4294901760, %v4095_v3 }
 0x14b   :  { %5550 = vst [vmem:[#allocation31_spill] sm:$0xff] %v4120_v6  ;;  %2772 = vmatpush3.msra.mxu0 %v4025_v2  ;;  %2799 = vmatpush3.msra.mxu1 %v1092_v38  ;;  %v1218_v27 = vand.u32 4294901760, %v1217_v4  ;;  %v5329_v40 = vand.u32 4294901760, %v4117_v5  ;;  %v4145_v14 = vsub.f32 %v3987_v61, %v4002_v53  ;;  %v4148_v50 = vand.u32 4294901760, %v4110_v32  ;;  %v4165_v61 = vld [vmem:[%s5256_s4 + $0xa0] sm:$0xff] }
 0x14c   :  { %5551 = vst [vmem:[#allocation32_spill] sm:$0xff] %v4134_v18  ;;  %2773 = vmatprep.subr.mxu0 %v4031_v35  ;;  %2800 = vmatprep.subr.mxu1 %v1211_v36  ;;  %v1105_v48 = vsub.f32 %v4102_v58, %v5326_v42  ;;  %v5331_v7 = vand.u32 4294901760, %v4131_v28  ;;  %v4157_v38 = vsub.f32 %v3992_v13, %v4025_v2  ;;  %v4160_v9 = vand.u32 4294901760, %v4125_v16 }
 0x14d   :  { %5552 = vst [vmem:[#allocation33_spill] sm:$0xff] %v4148_v50  ;;  %2774 = vmatpush3.msra.mxu0 %v4040_v37  ;;  %2801 = vmatpush3.msra.mxu1 %v1099_v17  ;;  %v1224_v36 = vsub.f32 %v4117_v5, %v5329_v40  ;;  %v5333_v4 = vand.u32 4294901760, %v4145_v14  ;;  %v4174_v13 = vsub.f32 %v4010_v29, %v4031_v35  ;;  %v4177_v42 = vand.u32 4294901760, %v4139_v54  ;;  %v4191_v29 = vld [vmem:[%s5256_s4 + $0x20] sm:$0xff] }
 0x14e   :  { %5553 = vst [vmem:[#allocation34_spill] sm:$0xff] %v4160_v9  ;;  %2775 = vmatprep.subr.mxu0 %v4056_v55  ;;  %2802 = vmatprep.subr.mxu1 %v1218_v27  ;;  %v1106_v45 = vand.u32 4294901760, %v1105_v48  ;;  %v1112_v17 = vsub.f32 %v4131_v28, %v5331_v7  ;;  %v5336_v33 = vand.u32 4294901760, %v4157_v38  ;;  %v4186_v40 = vsub.f32 %v4015_v47, %v4040_v37  ;;  %v4204_v47 = vld [vmem:[%s5256_s4 + $0x98] sm:$0xff] }
 0x14f   :  { %5554 = vst [vmem:[#allocation35_spill] sm:$0xff] %v4177_v42  ;;  %2776 = vmatpush3.msra.mxu0 %v4080_v52  ;;  %v1225_v30 = vand.u32 4294901760, %v1224_v36  ;;  %v1231_v27 = vsub.f32 %v4145_v14, %v5333_v4  ;;  %v5338_v48 = vand.u32 4294901760, %v4174_v13  ;;  %v4199_v7 = vand.u32 4294901760, %v4165_v61 }
 0x150   :  { %2803 = vmatpush3.msra.mxu1 %v1106_v45  ;;  %2777 = vmatprep.subr.mxu0 %v4105_v26  ;;  %v1113_v57 = vand.u32 4294901760, %v1112_v17  ;;  %v1119_v36 = vsub.f32 %v4157_v38, %v5336_v33  ;;  %v5339_v4 = vand.u32 4294901760, %v4186_v40  ;;  %v4213_v51 = vsub.f32 %v4020_v49, %v4056_v55 }
 0x151   :  { %5555 = vst [vmem:[#allocation36_spill] sm:$0xff] %v4199_v7  ;;  %2804 = vmatprep.subr.mxu1 %v1225_v30  ;;  %2778 = vmatpush3.msra.mxu0 %v4120_v6  ;;  %v1232_v45 = vand.u32 4294901760, %v1231_v27  ;;  %v1238_v17 = vsub.f32 %v4174_v13, %v5338_v48  ;;  %v4225_v33 = vand.u32 4294901760, %v4191_v29  ;;  %v4229_v49 = vsub.f32 %v4045_v8, %v4080_v52  ;;  %v4247_v8 = vld [vmem:[%s5256_s4 + $0x10] sm:$0xff]  ;;  %v4261_v48 = vld [vmem:[%s5256_s4 + $0x88] sm:$0xff] }
 0x152   :  { %2805 = vmatpush3.msra.mxu1 %v1113_v57  ;;  %2779 = vmatprep.subr.mxu0 %v4134_v18  ;;  %v1120_v30 = vand.u32 4294901760, %v1119_v36  ;;  %v1126_v27 = vsub.f32 %v4186_v40, %v5339_v4  ;;  %v4242_v41 = vand.u32 4294901760, %v4204_v47  ;;  %v4253_v20 = vsub.f32 %v4072_v62, %v4105_v26 }
 0x153   :  { %5556 = vst [vmem:[#allocation37_spill] sm:$0xff] %v4225_v33  ;;  %2806 = vmatprep.subr.mxu1 %v1232_v45  ;;  %2780 = vmatpush3.msra.mxu0 %v4148_v50  ;;  %v1239_v57 = vand.u32 4294901760, %v1238_v17  ;;  %v4256_v4 = vand.u32 4294901760, %v4218_v0  ;;  %v5557_v17 = vand.u32 4294901760, %v4213_v51  ;;  %v4269_v62 = vsub.f32 %v4085_v56, %v4120_v6  ;;  %v4289_v56 = vld [vmem:[%s5256_s4 + $0x8] sm:$0xff] }
 0x154   :  { %2807 = vmatpush3.msra.mxu1 %v1120_v30  ;;  %2781 = vmatprep.subr.mxu0 %v4160_v9  ;;  %v1127_v45 = vand.u32 4294901760, %v1126_v27  ;;  %v4272_v26 = vand.u32 4294901760, %v4234_v39  ;;  %v5559_v52 = vand.u32 4294901760, %v4229_v49  ;;  %v4281_v55 = vsub.f32 %v4095_v3, %v4134_v18  ;;  %v4303_v18 = vld [vmem:[%s5256_s4 + $0x80] sm:$0xff] }
 0x155   :  { %v1245_v36 = vsub.f32 %v4213_v51, %v5557_v17  ;;  %2808 = vmatprep.subr.mxu1 %v1239_v57  ;;  %2782 = vmatpush3.msra.mxu0 %v4177_v42  ;;  %v4284_v17 = vand.u32 4294901760, %v4247_v8  ;;  %v4295_v27 = vsub.f32 %v4110_v32, %v4148_v50  ;;  %v4298_v3 = vand.u32 4294901760, %v4261_v48 }
 0x156   :  { %5558 = vst [vmem:[#allocation38_spill] sm:$0xff] %v4272_v26  ;;  %v1133_v30 = vsub.f32 %v4229_v49, %v5559_v52  ;;  %2809 = vmatpush3.msra.mxu1 %v1127_v45  ;;  %2783 = vmatprep.subr.mxu0 %v4199_v7  ;;  %v5562_v6 = vand.u32 4294901760, %v4253_v20  ;;  %v5362_v52 = vand.u32 4294901760, %v4281_v55  ;;  %v4312_v32 = vsub.f32 %v4125_v16, %v4160_v9  ;;  %v4329_v16 = vld [vmem:[%s5256_s4] sm:$0xff] }
 0x157   :  { %5560 = vst [vmem:[#allocation39_spill] sm:$0xff] %v4284_v17  ;;  %v1246_v57 = vand.u32 4294901760, %v1245_v36  ;;  %5561 = vst [vmem:[#allocation40_spill] sm:$0xff] %v4298_v3  ;;  %2784 = vmatpush3.msra.mxu0 %v4225_v33  ;;  %v5564_v50 = vand.u32 4294901760, %v4269_v62  ;;  %v4337_v9 = vand.u32 4294901760, %v4303_v18  ;;  %v4353_v53 = vand.u32 4294901760, %v4329_v16 }
 0x158   :  { %v1134_v45 = vand.u32 4294901760, %v1133_v30  ;;  %v1252_v36 = vsub.f32 %v4253_v20, %v5562_v6  ;;  %5563 = vst [vmem:[#allocation41_spill] sm:$0xff] %v4312_v32  ;;  %2785 = vmatprep.subr.mxu0 %v4242_v41  ;;  %v4320_v30 = vand.u32 4294901760, %v4289_v56  ;;  %v4324_v6 = vsub.f32 %v4139_v54, %v4177_v42 }
 0x159   :  { %2810 = vmatprep.subr.mxu1 %v1246_v57  ;;  %v1140_v37 = vsub.f32 %v4269_v62, %v5564_v50  ;;  %2786 = vmatpush3.msra.mxu0 %v4256_v4  ;;  %v1259_v50 = vsub.f32 %v4281_v55, %v5362_v52  ;;  %v5367_v35 = vand.u32 4294901760, %v4312_v32  ;;  %v5565_v42 = vand.u32 4294901760, %v4295_v27 }
 0x15a   :  { %2811 = vmatpush3.msra.mxu1 %v1134_v45  ;;  %v1253_v57 = vand.u32 4294901760, %v1252_v36  ;;  %2787 = vmatprep.subr.mxu0 %v4272_v26  ;;  %v4346_v36 = vsub.f32 %v4165_v61, %v4199_v7  ;;  %v5566_v61 = vand.u32 4294901760, %v4324_v6  ;;  %v5567_v7 = vmax.f32 %v3923_v24, 0.0 }
 0x15b   :  { %v1141_v54 = vand.u32 4294901760, %v1140_v37  ;;  %v1147_v2 = vsub.f32 %v4295_v27, %v5565_v42  ;;  %v1260_v52 = vand.u32 4294901760, %v1259_v50  ;;  %2788 = vmatpush3.msra.mxu0 %v4284_v17  ;;  %v1266_v37 = vsub.f32 %v4312_v32, %v5367_v35 }
 0x15c   :  { %2812 = vmatprep.subr.mxu1 %v1253_v57  ;;  %v4357_v42 = vsub.f32 %v4191_v29, %v4225_v33  ;;  %2789 = vmatprep.subr.mxu0 %v4298_v3  ;;  %v1154_v57 = vsub.f32 %v4324_v6, %v5566_v61  ;;  %v5372_v50 = vand.u32 4294901760, %v4346_v36  ;;  %v4366_v35 = vand.u32 4294901760, %v5567_v7 }
 0x15d   :  { %2813 = vmatpush3.msra.mxu1 %v1141_v54  ;;  %v1148_v45 = vand.u32 4294901760, %v1147_v2  ;;  %v1267_v32 = vand.u32 4294901760, %v1266_v37  ;;  %2790 = vmatpush3.msra.mxu0 %v4320_v30  ;;  %v4372_v2 = vsub.f32 %v4204_v47, %v4242_v41  ;;  %v5569_v54 = vmax.f32 %v3921_v19, 0.0 }
 0x15e   :  { %5568 = vst [vmem:[#allocation42_spill] sm:$0xff] %v4366_v35  ;;  %2814 = vmatprep.subr.mxu1 %v1260_v52  ;;  %v5374_v29 = vand.u32 4294901760, %v4357_v42  ;;  %v1155_v61 = vand.u32 4294901760, %v1154_v57  ;;  %2791 = vmatprep.subr.mxu0 %v4337_v9  ;;  %v1273_v7 = vsub.f32 %v4346_v36, %v5372_v50  ;;  %v5571_v52 = vmax.f32 %v3923_v24, 0.0 }
 0x15f   :  { %v4376_v33 = vand.u32 4294901760, %v5569_v54  ;;  %2815 = vmatpush3.msra.mxu1 %v1148_v45  ;;  %v4389_v47 = vsub.f32 %v4218_v0, %v4256_v4  ;;  %2792 = vmatpush3.msra.mxu0 %v4353_v53 }
 0x160   :  { %v4385_v37 = vsub.f32 %v5571_v52, %v4366_v35  ;;  %2816 = vmatprep.subr.mxu1 %v1267_v32  ;;  %v1161_v45 = vsub.f32 %v4357_v42, %v5374_v29  ;;  %v4403_v52 = vsub.f32 %v4234_v39, %v4272_v26  ;;  %v1274_v0 = vand.u32 4294901760, %v1273_v7  ;;  %2831 = vmatprep.subr.mxu0 %v3977_v34 }
 0x161   :  { %5570 = vst [vmem:[#allocation43_spill] sm:$0xff] %v4376_v33  ;;  %v4399_v50 = vsub.f32 %v5569_v54, %v4376_v33  ;;  %2817 = vmatpush3.msra.mxu1 %v1155_v61  ;;  %v5381_v24 = vand.u32 4294901760, %v4389_v47  ;;  %v4410_v29 = vsub.f32 %v4247_v8, %v4284_v17  ;;  %v5572_v54 = vand.u32 4294901760, %v4372_v2  ;;  %1305 = vmatprep.mubr.f32.mxu1 %v4366_v35 }
 0x162   :  { %v5378_v32 = vand.u32 4294901760, %v4385_v37  ;;  %v1162_v57 = vand.u32 4294901760, %v1161_v45  ;;  %2818 = vmatprep.subr.mxu1 %v1274_v0  ;;  %v5574_v35 = vand.u32 4294901760, %v4403_v52  ;;  %v4437_v17 = vsub.f32 %v4289_v56, %v4320_v30 }
 0x163   :  { %v1280_v19 = vsub.f32 %v4372_v2, %v5572_v54  ;;  %v1168_v8 = vsub.f32 %v4389_v47, %v5381_v24  ;;  %v4427_v54 = vsub.f32 %v4261_v48, %v4298_v3  ;;  %v5573_v61 = vand.u32 4294901760, %v4399_v50 }
 0x164   :  { %v1067_v7 = vsub.f32 %v4385_v37, %v5378_v32  ;;  %2819 = vmatpush3.msra.mxu1 %v1162_v57  ;;  %v1287_v32 = vsub.f32 %v4403_v52, %v5574_v35  ;;  %5575 = vst [vmem:[#allocation44_spill] sm:$0xff] %v4437_v17  ;;  %v5576_v26 = vand.u32 4294901760, %v4410_v29  ;;  %v4446_v35 = vsub.f32 %v4303_v18, %v4337_v9 }
 0x165   :  { %v1281_v39 = vand.u32 4294901760, %v1280_v19  ;;  %v1073_v0 = vsub.f32 %v4399_v50, %v5573_v61  ;;  %v1169_v45 = vand.u32 4294901760, %v1168_v8  ;;  %v5389_v19 = vand.u32 4294901760, %v4427_v54 }
 0x166   :  { %v1068_v24 = vand.u32 4294901760, %v1067_v7  ;;  %v1175_v48 = vsub.f32 %v4410_v29, %v5576_v26  ;;  %v1288_v3 = vand.u32 4294901760, %v1287_v32  ;;  %v5388_v61 = vand.u32 4294901760, %v4437_v17  ;;  %5577 = vst [vmem:[#allocation45_spill] sm:$0xff] %v4446_v35 }
 0x167   :  { %2820 = vmatprep.subr.mxu1 %v1281_v39  ;;  %v1074_v57 = vand.u32 4294901760, %v1073_v0  ;;  %v1294_v7 = vsub.f32 %v4427_v54, %v5389_v19  ;;  %v4453_v26 = vsub.f32 %v4329_v16, %v4353_v53  ;;  %v5387_v18 = vand.u32 4294901760, %v4446_v35  ;;  %v5593_v19 = vld [vmem:[#allocation37_spill] sm:$0xff] }
 0x168   :  { %1069 = vmatprep.mubr.f32.mxu0 %v1068_v24  ;;  %2821 = vmatpush3.msra.mxu1 %v1169_v45  ;;  %v1176_v56 = vand.u32 4294901760, %v1175_v48  ;;  %v1182_v32 = vsub.f32 %v4437_v17, %v5388_v61  ;;  %v5579_v48 = vld [vmem:[#allocation24_spill] sm:$0xff] }
 0x169   :  { %5578 = vst [vmem:[#allocation46_spill] sm:$0xff] %v4453_v26  ;;  %1075 = vmatmul.mubr.f32.vlgmr.msra.gmra.mxu0 %v1074_v57  ;;  %2822 = vmatprep.subr.mxu1 %v1288_v3  ;;  %v1295_v24 = vand.u32 4294901760, %v1294_v7  ;;  %v5386_v39 = vand.u32 4294901760, %v4453_v26  ;;  %v1301_v16 = vsub.f32 %v4446_v35, %v5387_v18  ;;  %v5580_v57 = vld [vmem:[#allocation25_spill] sm:$0xff]  ;;  %v5582_v7 = vld [vmem:[#allocation26_spill] sm:$0xff]  ;;  %v5591_v18 = vld [vmem:[#allocation35_spill] sm:$0xff] }
 0x16a   :  { %2832 = vmatpush3.msra.mxu0 %v3999_v44  ;;  %2823 = vmatpush3.msra.mxu1 %v1176_v56  ;;  %v1183_v8 = vand.u32 4294901760, %v1182_v32  ;;  %v5581_v56 = vld [vmem:[#allocation41_spill] sm:$0xff]  ;;  %v5583_v32 = vld [vmem:[#allocation27_spill] sm:$0xff]  ;;  %v5592_v61 = vld [vmem:[#allocation36_spill] sm:$0xff] }
 0x16b   :  { %2833 = vmatprep.subr.mxu0 %v4005_v22  ;;  %1442 = vmatprep.mubr.f32.mxu0 %v4385_v37  ;;  %v1189_v3 = vsub.f32 %v4453_v26, %v5386_v39  ;;  %v1302_v45 = vand.u32 4294901760, %v1301_v16  ;;  %v5586_v16 = vld [vmem:[#allocation30_spill] sm:$0xff] }
 0x16c   :  { %2834 = vmatpush3.msra.mxu0 %v4028_v63  ;;  %2824 = vmatprep.subr.mxu1 %v1295_v24  ;;  %v5584_v24 = vld [vmem:[#allocation28_spill] sm:$0xff]  ;;  %v5590_v39 = vld [vmem:[#allocation34_spill] sm:$0xff] }
 0x16d   :  { %2835 = vmatprep.subr.mxu0 %v4037_v15  ;;  %2825 = vmatpush3.msra.mxu1 %v1183_v8  ;;  %v1190_v0 = vand.u32 4294901760, %v1189_v3  ;;  %v5585_v8 = vld [vmem:[#allocation29_spill] sm:$0xff]  ;;  %v5587_v3 = vld [vmem:[#allocation31_spill] sm:$0xff] }
 0x16e   :  { %2836 = vmatpush3.msra.mxu0 %v4053_v21  ;;  %2826 = vmatprep.subr.mxu1 %v1302_v45  ;;  %v5588_v45 = vld [vmem:[#allocation32_spill] sm:$0xff] }
 0x16f   :  { %2837 = vmatprep.subr.mxu0 %v4067_v59  ;;  %2827 = vmatpush3.msra.mxu1 %v1190_v0  ;;  %v5589_v0 = vld [vmem:[#allocation33_spill] sm:$0xff] }
 0x170   :  { %2838 = vmatpush3.msra.mxu0 %v4102_v58  ;;  %1307 = vmatmul.mubr.f32.vlgmr.msra.gmra.mxu1 %v4376_v33  ;;  %v5594_v33 = vand.u32 4294901760, %v3977_v34  ;;  %v5601_v34 = vand.u32 4294901760, %v4037_v15  ;;  %v5606_v15 = vand.u32 4294901760, %v4399_v50 }
 0x171   :  { %2839 = vmatprep.subr.mxu0 %v4117_v5  ;;  %2866 = vmatprep.subr.mxu1 %v3939_v46 }
 0x172   :  { %2840 = vmatpush3.msra.mxu0 %v4131_v28  ;;  %2867 = vmatpush3.msra.mxu1 %v3941_v60 }
 0x173   :  { %2841 = vmatprep.subr.mxu0 %v4145_v14  ;;  %2868 = vmatprep.subr.mxu1 %v3943_v1 }
 0x174   :  { %2842 = vmatpush3.msra.mxu0 %v4157_v38  ;;  %2869 = vmatpush3.msra.mxu1 %v3954_v10 }
 0x175   :  { %2843 = vmatprep.subr.mxu0 %v4174_v13  ;;  %2870 = vmatprep.subr.mxu1 %v3956_v11 }
 0x176   :  { %2844 = vmatpush3.msra.mxu0 %v4186_v40  ;;  %2871 = vmatpush3.msra.mxu1 %v3958_v12 }
 0x177   :  { %2845 = vmatprep.subr.mxu0 %v4213_v51  ;;  %2872 = vmatprep.subr.mxu1 %v3970_v23 }
 0x178   :  { %2846 = vmatpush3.msra.mxu0 %v4229_v49  ;;  %2873 = vmatpush3.msra.mxu1 %v3972_v25 }
 0x179   :  { %2847 = vmatprep.subr.mxu0 %v4253_v20  ;;  %2874 = vmatprep.subr.mxu1 %v3974_v31 }
 0x17a   :  { %2848 = vmatpush3.msra.mxu0 %v4269_v62  ;;  %2875 = vmatpush3.msra.mxu1 %v3996_v43 }
 0x17b   :  { %2849 = vmatprep.subr.mxu0 %v4281_v55  ;;  %2876 = vmatprep.subr.mxu1 %v5579_v48 }
 0x17c   :  { %2850 = vmatpush3.msra.mxu0 %v4295_v27  ;;  %2877 = vmatpush3.msra.mxu1 %v5580_v57 }
 0x17d   :  { %2851 = vmatprep.subr.mxu0 %v5581_v56  ;;  %2878 = vmatprep.subr.mxu1 %v5582_v7 }
 0x17e   :  { %2852 = vmatpush3.msra.mxu0 %v4324_v6  ;;  %2879 = vmatpush3.msra.mxu1 %v5583_v32 }
 0x17f   :  { %2853 = vmatprep.subr.mxu0 %v4346_v36  ;;  %2880 = vmatprep.subr.mxu1 %v5584_v24 }
 0x180   :  { %2854 = vmatpush3.msra.mxu0 %v4357_v42  ;;  %2881 = vmatpush3.msra.mxu1 %v5585_v8 }
 0x181   :  { %2855 = vmatprep.subr.mxu0 %v4372_v2  ;;  %2882 = vmatprep.subr.mxu1 %v5586_v16 }
 0x182   :  { %2856 = vmatpush3.msra.mxu0 %v4389_v47  ;;  %2883 = vmatpush3.msra.mxu1 %v5587_v3 }
 0x183   :  { %2857 = vmatprep.subr.mxu0 %v4403_v52  ;;  %2884 = vmatprep.subr.mxu1 %v5588_v45 }
 0x184   :  { %2858 = vmatpush3.msra.mxu0 %v4410_v29  ;;  %2885 = vmatpush3.msra.mxu1 %v5589_v0 }
 0x185   :  { %2859 = vmatprep.subr.mxu0 %v4427_v54  ;;  %2886 = vmatprep.subr.mxu1 %v5590_v39 }
 0x186   :  { %2860 = vmatpush3.msra.mxu0 %v4437_v17  ;;  %2887 = vmatpush3.msra.mxu1 %v5591_v18  ;;  %v5595_v17 = vand.u32 4294901760, %v3999_v44  ;;  %v5596_v18 = vld [vmem:[#allocation38_spill] sm:$0xff]  ;;  %v5602_v44 = vand.u32 4294901760, %v4053_v21  ;;  %v5608_v21 = vand.u32 4294901760, %v4131_v28  ;;  %v5625_v28 = vand.u32 4294901760, %v4403_v52 }
 0x187   :  { %2861 = vmatprep.subr.mxu0 %v4446_v35  ;;  %2888 = vmatprep.subr.mxu1 %v5592_v61  ;;  %v5597_v61 = vand.u32 4294901760, %v4005_v22  ;;  %v5600_v35 = vld [vmem:[#allocation40_spill] sm:$0xff]  ;;  %v5603_v22 = vand.u32 4294901760, %v4067_v59  ;;  %v5609_v59 = vand.u32 4294901760, %v4145_v14  ;;  %v5627_v14 = vand.u32 4294901760, %v4427_v54 }
 0x188   :  { %2862 = vmatpush3.msra.mxu0 %v4453_v26  ;;  %2889 = vmatpush3.msra.mxu1 %v5593_v19  ;;  %v5598_v26 = vld [vmem:[#allocation39_spill] sm:$0xff]  ;;  %v5599_v19 = vand.u32 4294901760, %v4028_v63  ;;  %v5604_v63 = vand.u32 4294901760, %v4385_v37 }
 0x189   :  { %1445 = vmatmul.mubr.f32.vlgmr.msra.gmra.mxu0 %v4399_v50  ;;  %2890 = vmatprep.subr.mxu1 %v4242_v41  ;;  %v5636_v50 = vld [vmem:[#allocation42_spill] sm:$0xff] }
 0x18a   :  { %2901 = vmatprep.subr.mxu0 %v5594_v33  ;;  %2891 = vmatpush3.msra.mxu1 %v4256_v4  ;;  %v5605_v33 = vand.u32 4294901760, %v4102_v58  ;;  %v5610_v58 = vand.u32 4294901760, %v4157_v38  ;;  %v5628_v38 = vld [vmem:[#allocation44_spill] sm:$0xff] }
 0x18b   :  { %2902 = vmatpush3.msra.mxu0 %v5595_v17  ;;  %2892 = vmatprep.subr.mxu1 %v5596_v18  ;;  %v5607_v17 = vand.u32 4294901760, %v4117_v5  ;;  %v5611_v5 = vand.u32 4294901760, %v4174_v13  ;;  %v5629_v13 = vand.u32 4294901760, %v5628_v38 }
 0x18c   :  { %2903 = vmatprep.subr.mxu0 %v5597_v61  ;;  %2893 = vmatpush3.msra.mxu1 %v5598_v26 }
 0x18d   :  { %2904 = vmatpush3.msra.mxu0 %v5599_v19  ;;  %2894 = vmatprep.subr.mxu1 %v5600_v35  ;;  %v2756_v19 = vld [vmem:[%s5257_s5] ss:$0 sm:$0xff] }
 0x18e   :  { %2905 = vmatprep.subr.mxu0 %v5601_v34  ;;  %2895 = vmatpush3.msra.mxu1 %v4320_v30 }
 0x18f   :  { %2906 = vmatpush3.msra.mxu0 %v5602_v44  ;;  %2896 = vmatprep.subr.mxu1 %v4337_v9 }
 0x190   :  { %2907 = vmatprep.subr.mxu0 %v5603_v22  ;;  %2897 = vmatpush3.msra.mxu1 %v4353_v53 }
 0x191   :  { %1549 = vmatprep.mubr.f32.mxu1 %v5604_v63  ;;  %2908 = vmatpush3.msra.mxu0 %v5605_v33 }
 0x192   :  { %1553 = vmatmul.mubr.f32.vlgmr.msra.gmra.mxu1 %v5606_v15  ;;  %2909 = vmatprep.subr.mxu0 %v5607_v17 }
 0x193   :  { %2936 = vmatprep.subr.mxu1 %v3939_v46  ;;  %2910 = vmatpush3.msra.mxu0 %v5608_v21  ;;  %v5612_v46 = vand.u32 4294901760, %v4186_v40  ;;  %v5626_v40 = vand.u32 4294901760, %v4410_v29  ;;  %v5637_v29 = vld [vmem:[#allocation37_spill] sm:$0xff] }
 0x194   :  { %2937 = vmatpush3.msra.mxu1 %v3941_v60  ;;  %2911 = vmatprep.subr.mxu0 %v5609_v59  ;;  %v5613_v60 = vand.u32 4294901760, %v4213_v51  ;;  %v5623_v51 = vand.u32 4294901760, %v4372_v2  ;;  %v5638_v2 = vld [vmem:[#allocation43_spill] sm:$0xff] }
 0x195   :  { %2938 = vmatprep.subr.mxu1 %v3943_v1  ;;  %2912 = vmatpush3.msra.mxu0 %v5610_v58  ;;  %v5614_v1 = vand.u32 4294901760, %v4229_v49  ;;  %v5630_v49 = vld [vmem:[#allocation35_spill] sm:$0xff] }
 0x196   :  { %2939 = vmatpush3.msra.mxu1 %v3954_v10  ;;  %2913 = vmatprep.subr.mxu0 %v5611_v5  ;;  %v5615_v10 = vand.u32 4294901760, %v4253_v20  ;;  %v5619_v20 = vand.u32 4294901760, %v5581_v56 }
 0x197   :  { %2940 = vmatprep.subr.mxu1 %v3956_v11  ;;  %2914 = vmatpush3.msra.mxu0 %v5612_v46  ;;  %v5616_v11 = vand.u32 4294901760, %v4269_v62  ;;  %v5631_v62 = vld [vmem:[#allocation45_spill] sm:$0xff] }
 0x198   :  { %2941 = vmatpush3.msra.mxu1 %v3958_v12  ;;  %2915 = vmatprep.subr.mxu0 %v5613_v60  ;;  %v5617_v12 = vand.u32 4294901760, %v4281_v55  ;;  %v5624_v55 = vand.u32 4294901760, %v4389_v47 }
 0x199   :  { %2942 = vmatprep.subr.mxu1 %v3970_v23  ;;  %2916 = vmatpush3.msra.mxu0 %v5614_v1  ;;  %v5618_v23 = vand.u32 4294901760, %v4295_v27  ;;  %v5632_v27 = vand.u32 4294901760, %v5631_v62 }
 0x19a   :  { %2943 = vmatpush3.msra.mxu1 %v3972_v25  ;;  %2917 = vmatprep.subr.mxu0 %v5615_v10  ;;  %v5620_v25 = vand.u32 4294901760, %v4324_v6  ;;  %v5633_v6 = vld [vmem:[#allocation36_spill] sm:$0xff] }
 0x19b   :  { %2944 = vmatprep.subr.mxu1 %v3974_v31  ;;  %2918 = vmatpush3.msra.mxu0 %v5616_v11  ;;  %v5621_v31 = vand.u32 4294901760, %v4346_v36  ;;  %v5634_v36 = vld [vmem:[#allocation46_spill] sm:$0xff] }
 0x19c   :  { %2945 = vmatpush3.msra.mxu1 %v3996_v43  ;;  %2919 = vmatprep.subr.mxu0 %v5617_v12  ;;  %v5622_v43 = vand.u32 4294901760, %v4357_v42  ;;  %v5635_v42 = vand.u32 4294901760, %v5634_v36 }
 0x19d   :  { %2946 = vmatprep.subr.mxu1 %v5579_v48  ;;  %2920 = vmatpush3.msra.mxu0 %v5618_v23 }
 0x19e   :  { %2947 = vmatpush3.msra.mxu1 %v5580_v57  ;;  %2921 = vmatprep.subr.mxu0 %v5619_v20 }
 0x19f   :  { %2948 = vmatprep.subr.mxu1 %v5582_v7  ;;  %2922 = vmatpush3.msra.mxu0 %v5620_v25 }
 0x1a0   :  { %2949 = vmatpush3.msra.mxu1 %v5583_v32  ;;  %2923 = vmatprep.subr.mxu0 %v5621_v31 }
 0x1a1   :  { %2950 = vmatprep.subr.mxu1 %v5584_v24  ;;  %2924 = vmatpush3.msra.mxu0 %v5622_v43 }
 0x1a2   :  { %2951 = vmatpush3.msra.mxu1 %v5585_v8  ;;  %2925 = vmatprep.subr.mxu0 %v5623_v51 }
 0x1a3   :  { %2952 = vmatprep.subr.mxu1 %v5586_v16  ;;  %2926 = vmatpush3.msra.mxu0 %v5624_v55 }
 0x1a4   :  { %2953 = vmatpush3.msra.mxu1 %v5587_v3  ;;  %2927 = vmatprep.subr.mxu0 %v5625_v28 }
 0x1a5   :  { %2954 = vmatprep.subr.mxu1 %v5588_v45  ;;  %2928 = vmatpush3.msra.mxu0 %v5626_v40 }
 0x1a6   :  { %2955 = vmatpush3.msra.mxu1 %v5589_v0  ;;  %2929 = vmatprep.subr.mxu0 %v5627_v14 }
 0x1a7   :  { %2956 = vmatprep.subr.mxu1 %v5590_v39  ;;  %2930 = vmatpush3.msra.mxu0 %v5629_v13 }
 0x1a8   :  { %2957 = vmatpush3.msra.mxu1 %v5630_v49  ;;  %2931 = vmatprep.subr.mxu0 %v5632_v27 }
 0x1a9   :  { %2958 = vmatprep.subr.mxu1 %v5633_v6  ;;  %2932 = vmatpush3.msra.mxu0 %v5635_v42 }
 0x1aa   :  { %1719 = vmatprep.mubr.f32.mxu0 %v5636_v50  ;;  %2959 = vmatpush3.msra.mxu1 %v5637_v29 }
 0x1ab   :  { %1721 = vmatmul.mubr.f32.vlgmr.msra.gmra.mxu0 %v5638_v2  ;;  %2960 = vmatprep.subr.mxu1 %v4242_v41 }
 0x1ac   :  { %1823 = vmatprep.mubr.f32.mxu1 %v5636_v50  ;;  %2961 = vmatpush3.msra.mxu1 %v4256_v4 }
 0x1ad   :  { %2962 = vmatprep.subr.mxu1 %v5596_v18 }
 0x1ae   :  { %2963 = vmatpush3.msra.mxu1 %v5598_v26 }
 0x1af   :  { %2964 = vmatprep.subr.mxu1 %v5600_v35 }
 0x1b0   :  { %2965 = vmatpush3.msra.mxu1 %v4320_v30 }
 0x1b1   :  { %2966 = vmatprep.subr.mxu1 %v4337_v9 }
 0x1b2   :  { %2967 = vmatpush3.msra.mxu1 %v4353_v53 }
 0x1b3   :  { %1825 = vmatmul.mubr.f32.vlgmr.msra.gmra.mxu1 %v5638_v2 }
 0x229   :  { %v2793_v37 = vpop.f32.mrf.mxu0 }
 0x22b   :  { %v2794_v41 = vpop.f32.mrf.mxu0 }
 0x22c   :  { %v2795_v4 = vadd.f32 %v2794_v41, %v2793_v37 }
 0x22e   :  { %v1077_v30 = vadd.f32 %v2795_v4, %v2756_v19 }
 0x230   :  { %v2828_v47 = vpop.f32.mrf.mxu1 }
 0x232   :  { %v2829_v54 = vpop.f32.mrf.mxu1 }
 0x233   :  { %v2830_v18 = vadd.f32 %v2829_v54, %v2828_v47 }
 0x235   :  { %v1309_v48 = vadd.f32 %v2830_v18, %v1077_v30 }
 0x249   :  { %v2863_v52 = vpop.f32.mrf.mxu0 }
 0x24b   :  { %v2864_v61 = vpop.f32.mrf.mxu0 }
 0x24c   :  { %v2865_v39 = vadd.f32 %v2864_v61, %v2863_v52 }
 0x24e   :  { %v1447_v56 = vadd.f32 %v2865_v39, %v1309_v48 }
 0x252   :  { %v2898_v35 = vpop.f32.mrf.mxu1 }
 0x254   :  { %v2899_v9 = vpop.f32.mrf.mxu1 }
 0x255   :  { %v2900_v57 = vadd.f32 %v2899_v9, %v2898_v35 }
 0x257   :  { %v1555_v24 = vadd.f32 %v2900_v57, %v1447_v56 }
 0x26b   :  { %v2933_v26 = vpop.f32.mrf.mxu0 }
 0x26d   :  { %v2934_v53 = vpop.f32.mrf.mxu0 }
 0x26e   :  { %v2935_v7 = vadd.f32 %v2934_v53, %v2933_v26 }
 0x270   :  { %v1723_v16 = vadd.f32 %v2935_v7, %v1555_v24 }
 0x273   :  { %v2968_v32 = vpop.f32.mrf.mxu1 }
 0x275   :  { %v2969_v8 = vpop.f32.mrf.mxu1 }
 0x276   :  { %v2970_v3 = vadd.f32 %v2969_v8, %v2968_v32 }
 0x278   :  { %v1827_v45 = vadd.f32 %v2970_v3, %v1723_v16 }
 0x27a   :  { %1831 = vst.msk [vmem:[%s5258_s6] sm:$0xff] %vm1830_vm0, %v1827_v45 }
 0x27b PF:  { %p2757_p1 = scmp.gt.s32.totalorder %s5254_s0, 0 }
 0x27d   :  { %1835 = sbr.rel (%p2757_p1) target bundleno = 990 (0x3de), region = 29 }
 0x282   :  { %v1879_v0 = vld [vmem:[%s5256_s4 + $0xf8] sm:$0xff]  ;;  %v1878_v44 = vld [vmem:[%s5256_s4 + $0xf0] sm:$0xff]  ;;  %v1877_v59 = vld [vmem:[%s5256_s4 + $0xe8] sm:$0xff]  ;;  %vm2749_vm1 = vcmask 523264  }
 0x283   :  { %v1863_v34 = vld [vmem:[%s5256_s4 + $0x78] sm:$0xff]  ;;  %v4655_v33 = vand.u32 4294901760, %v1879_v0  ;;  %v4659_v17 = vand.u32 4294901760, %v1878_v44  ;;  %v1862_v21 = vld [vmem:[%s5256_s4 + $0x70] sm:$0xff]  ;;  %v1861_v58 = vld [vmem:[%s5256_s4 + $0x68] sm:$0xff]  ;;  %v4672_v46 = vand.u32 4294901760, %v1877_v59 }
 0x284   :  { %v5639_v22 = vld [vmem:[#allocation19_spill] sm:$0xff]  ;;  %v4657_v15 = vand.u32 4294901760, %v1863_v34  ;;  %v4670_v5 = vand.u32 4294901760, %v1862_v21  ;;  %v4674_v60 = vand.u32 4294901760, %v1861_v58  ;;  %v1876_v1 = vld [vmem:[%s5256_s4 + $0xe0] sm:$0xff]  ;;  %v1874_v52 = vld [vmem:[%s5256_s4 + $0xd0] sm:$0xff] }
 0x285   :  { %v2759_v63 = vmul.f32 -1.442695, %v5639_v22  ;;  %v1860_v10 = vld [vmem:[%s5256_s4 + $0x60] sm:$0xff]  ;;  %2971 = vmatprep.subr.mxu0 %v4655_v33  ;;  %v4684_v11 = vsub.f32 %v1879_v0, %v4655_v33  ;;  %v4690_v23 = vsub.f32 %v1878_v44, %v4659_v17  ;;  %v4692_v20 = vand.u32 4294901760, %v1876_v1  ;;  %v1875_v25 = vld [vmem:[%s5256_s4 + $0xd8] sm:$0xff]  ;;  %v1858_v35 = vld [vmem:[%s5256_s4 + $0x50] sm:$0xff] }
 0x286   :  { %v4687_v12 = vsub.f32 %v1863_v34, %v4657_v15  ;;  %2972 = vmatpush3.msra.mxu0 %v4657_v15  ;;  %v4699_v31 = vsub.f32 %v1862_v21, %v4670_v5  ;;  %v4702_v43 = vsub.f32 %v1877_v59, %v4672_v46  ;;  %v4705_v51 = vsub.f32 %v1861_v58, %v4674_v60  ;;  %v1859_v47 = vld [vmem:[%s5256_s4 + $0x58] sm:$0xff]  ;;  %v1873_v26 = vld [vmem:[%s5256_s4 + $0xc8] sm:$0xff]  ;;  %v1872_v48 = vld [vmem:[%s5256_s4 + $0xc0] sm:$0xff] }
 0x287   :  { %3182 = vpow2.f32 %v2759_v63  ;;  %v4707_v55 = vand.u32 4294901760, %v1860_v10  ;;  %v5412_v28 = vand.u32 4294901760, %v4684_v11  ;;  %2973 = vmatprep.subr.mxu0 %v4659_v17  ;;  %v5410_v14 = vand.u32 4294901760, %v4690_v23  ;;  %v1857_v30 = vld [vmem:[%s5256_s4 + $0x48] sm:$0xff]  ;;  %v1856_v45 = vld [vmem:[%s5256_s4 + $0x40] sm:$0xff] }
 0x288   :  { %v5411_v40 = vand.u32 4294901760, %v4687_v12  ;;  %v4714_v38 = vsub.f32 %v1876_v1, %v4692_v20  ;;  %2974 = vmatpush3.msra.mxu0 %v4670_v5  ;;  %v5409_v13 = vand.u32 4294901760, %v4699_v31  ;;  %v5408_v49 = vand.u32 4294901760, %v4702_v43  ;;  %v1871_v1 = vld [vmem:[%s5256_s4 + $0xb8] sm:$0xff] }
 0x289   :  { %v5405_v62 = vand.u32 4294901760, %v4705_v51  ;;  %v4720_v27 = vand.u32 4294901760, %v1875_v25  ;;  %v2115_v6 = vsub.f32 %v4684_v11, %v5412_v28  ;;  %v2122_v42 = vsub.f32 %v4690_v23, %v5410_v14  ;;  %2975 = vmatprep.subr.mxu0 %v4672_v46 }
 0x28a   :  { %v2003_v36 = vsub.f32 %v4687_v12, %v5411_v40  ;;  %v5404_v50 = vand.u32 4294901760, %v4714_v38  ;;  %v2010_v29 = vsub.f32 %v4699_v31, %v5409_v13  ;;  %2976 = vmatpush3.msra.mxu0 %v4674_v60  ;;  %v2129_v2 = vsub.f32 %v4702_v43, %v5408_v49 }
 0x28b   :  { %v2017_v37 = vsub.f32 %v4705_v51, %v5405_v62  ;;  %v4744_v41 = vsub.f32 %v1860_v10, %v4707_v55  ;;  %v2116_v54 = vand.u32 4294901760, %v2115_v6  ;;  %v2123_v19 = vand.u32 4294901760, %v2122_v42  ;;  %2977 = vmatprep.subr.mxu0 %v4692_v20 }
 0x28c   :  { %v2004_v4 = vand.u32 4294901760, %v2003_v36  ;;  %v2136_v61 = vsub.f32 %v4714_v38, %v5404_v50  ;;  %v2011_v18 = vand.u32 4294901760, %v2010_v29  ;;  %v2130_v9 = vand.u32 4294901760, %v2129_v2  ;;  %2978 = vmatpush3.msra.mxu0 %v4707_v55 }
 0x28d   :  { %v2018_v39 = vand.u32 4294901760, %v2017_v37  ;;  %v5403_v53 = vand.u32 4294901760, %v4744_v41  ;;  %3006 = vmatprep.subr.mxu1 %v2116_v54  ;;  %2979 = vmatprep.subr.mxu0 %v4720_v27  ;;  %v4771_v56 = vand.u32 4294901760, %v1859_v47  ;;  %v4774_v7 = vsub.f32 %v1875_v25, %v4720_v27 }
 0x28e   :  { %v2137_v57 = vand.u32 4294901760, %v2136_v61  ;;  %v4776_v32 = vand.u32 4294901760, %v1874_v52  ;;  %3007 = vmatpush3.msra.mxu1 %v2004_v4  ;;  %v4781_v8 = vand.u32 4294901760, %v1858_v35  ;;  %v4783_v16 = vand.u32 4294901760, %v1873_v26 }
 0x28f   :  { %v2024_v24 = vsub.f32 %v4744_v41, %v5403_v53  ;;  %v4785_v3 = vand.u32 4294901760, %v1857_v30  ;;  %3008 = vmatprep.subr.mxu1 %v2123_v19  ;;  %2980 = vmatpush3.msra.mxu0 %v4771_v56  ;;  %v5401_v0 = vand.u32 4294901760, %v4774_v7  ;;  %v4793_v34 = vsub.f32 %v1859_v47, %v4771_v56 }
 0x290   :  { %v4796_v44 = vsub.f32 %v1874_v52, %v4776_v32  ;;  %v4798_v22 = vand.u32 4294901760, %v1872_v48  ;;  %3009 = vmatpush3.msra.mxu1 %v2011_v18  ;;  %2981 = vmatprep.subr.mxu0 %v4776_v32  ;;  %v4802_v21 = vsub.f32 %v1858_v35, %v4781_v8  ;;  %v4805_v59 = vsub.f32 %v1873_v26, %v4783_v16  ;;  %v1855_v52 = vld [vmem:[%s5256_s4 + $0x38] sm:$0xff] }
 0x291   :  { %v2025_v63 = vand.u32 4294901760, %v2024_v24  ;;  %v4808_v58 = vsub.f32 %v1857_v30, %v4785_v3  ;;  %3010 = vmatprep.subr.mxu1 %v2130_v9  ;;  %v2143_v25 = vsub.f32 %v4774_v7, %v5401_v0  ;;  %v5400_v6 = vand.u32 4294901760, %v4793_v34  ;;  %2982 = vmatpush3.msra.mxu0 %v4781_v8  ;;  %v1870_v9 = vld [vmem:[%s5256_s4 + $0xb0] sm:$0xff] }
 0x292   :  { %v5398_v36 = vand.u32 4294901760, %v4796_v44  ;;  %v4821_v42 = vand.u32 4294901760, %v1856_v45  ;;  %3011 = vmatpush3.msra.mxu1 %v2018_v39  ;;  %2983 = vmatprep.subr.mxu0 %v4783_v16  ;;  %v5397_v29 = vand.u32 4294901760, %v4802_v21  ;;  %v5396_v2 = vand.u32 4294901760, %v4805_v59 }
 0x293   :  { %v5395_v37 = vand.u32 4294901760, %v4808_v58  ;;  %v4828_v47 = vsub.f32 %v1872_v48, %v4798_v22  ;;  %3012 = vmatprep.subr.mxu1 %v2137_v57  ;;  %v2144_v54 = vand.u32 4294901760, %v2143_v25  ;;  %v2031_v4 = vsub.f32 %v4793_v34, %v5400_v6  ;;  %2984 = vmatpush3.msra.mxu0 %v4785_v3  ;;  %v1869_v25 = vld [vmem:[%s5256_s4 + $0xa8] sm:$0xff] }
 0x294   :  { %v4813_v10 = vpop.eup %3182  ;;  %v2150_v19 = vsub.f32 %v4796_v44, %v5398_v36  ;;  %v4840_v61 = vand.u32 4294901760, %v1871_v1  ;;  %3013 = vmatpush3.msra.mxu1 %v2025_v63  ;;  %v2038_v35 = vsub.f32 %v4802_v21, %v5397_v29  ;;  %v2157_v26 = vsub.f32 %v4805_v59, %v5396_v2  ;;  %2985 = vmatprep.subr.mxu0 %v4798_v22  ;;  %v1854_v63 = vld [vmem:[%s5256_s4 + $0x30] sm:$0xff] }
 0x295   :  { %v2045_v30 = vsub.f32 %v4808_v58, %v5395_v37  ;;  %v5399_v18 = vand.u32 4294901760, %v4828_v47  ;;  %3014 = vmatprep.subr.mxu1 %v2144_v54  ;;  %v2032_v39 = vand.u32 4294901760, %v2031_v4  ;;  %2986 = vmatpush3.msra.mxu0 %v4821_v42  ;;  %v4858_v57 = vsub.f32 %v1856_v45, %v4821_v42  ;;  %v1853_v54 = vld [vmem:[%s5256_s4 + $0x28] sm:$0xff] }
 0x296   :  { %v2151_v48 = vand.u32 4294901760, %v2150_v19  ;;  %v4860_v24 = vand.u32 4294901760, %v1855_v52  ;;  %v2039_v4 = vand.u32 4294901760, %v2038_v35  ;;  %v2158_v19 = vand.u32 4294901760, %v2157_v26  ;;  %2987 = vmatprep.subr.mxu0 %v4840_v61  ;;  %v1868_v26 = vld [vmem:[%s5256_s4 + $0xa0] sm:$0xff] }
 0x297   :  { %v2046_v37 = vand.u32 4294901760, %v2045_v30  ;;  %v2164_v45 = vsub.f32 %v4828_v47, %v5399_v18  ;;  %3015 = vmatpush3.msra.mxu1 %v2032_v39  ;;  %v5402_v2 = vand.u32 4294901760, %v4858_v57  ;;  %v4878_v29 = vsub.f32 %v1871_v1, %v4840_v61 }
 0x298   :  { %2988 = vmatpush3.msra.mxu0 %v4860_v24  ;;  %v4880_v36 = vand.u32 4294901760, %v1870_v9  ;;  %v4883_v35 = vsub.f32 %v1855_v52, %v4860_v24  ;;  %3016 = vmatprep.subr.mxu1 %v2151_v48  ;;  %v4888_v18 = vand.u32 4294901760, %v1854_v63  ;;  %v4890_v39 = vand.u32 4294901760, %v1869_v25 }
 0x299   :  { %5640 = vst [vmem:[#allocation47_spill] sm:$0xff] %v4878_v29  ;;  %v2165_v30 = vand.u32 4294901760, %v2164_v45  ;;  %v4892_v6 = vand.u32 4294901760, %v1853_v54  ;;  %3017 = vmatpush3.msra.mxu1 %v2039_v4  ;;  %v2052_v1 = vsub.f32 %v4858_v57, %v5402_v2  ;;  %v5406_v52 = vand.u32 4294901760, %v4878_v29  ;;  %v1852_v45 = vld [vmem:[%s5256_s4 + $0x20] sm:$0xff] }
 0x29a   :  { %5641 = vst [vmem:[#allocation48_spill] sm:$0xff] %v4883_v35  ;;  %2989 = vmatprep.subr.mxu0 %v4880_v36  ;;  %v5407_v0 = vand.u32 4294901760, %v4883_v35  ;;  %v4901_v48 = vsub.f32 %v1870_v9, %v4880_v36  ;;  %3018 = vmatprep.subr.mxu1 %v2158_v19  ;;  %v4908_v4 = vsub.f32 %v1854_v63, %v4888_v18  ;;  %v4913_v53 = vand.u32 4294901760, %v1868_v26 }
 0x29b   :  { %2990 = vmatpush3.msra.mxu0 %v4888_v18  ;;  %v4911_v2 = vsub.f32 %v1869_v25, %v4890_v39  ;;  %v4916_v50 = vsub.f32 %v1853_v54, %v4892_v6  ;;  %3019 = vmatpush3.msra.mxu1 %v2046_v37  ;;  %v2053_v9 = vand.u32 4294901760, %v2052_v1  ;;  %v2171_v62 = vsub.f32 %v4878_v29, %v5406_v52  ;;  %v1867_v25 = vld [vmem:[%s5256_s4 + $0x98] sm:$0xff] }
 0x29c   :  { %5642 = vst [vmem:[#allocation49_spill] sm:$0xff] %v4901_v48  ;;  %5643 = vst [vmem:[#allocation50_spill] sm:$0xff] %v4908_v4  ;;  %v2059_v19 = vsub.f32 %v4883_v35, %v5407_v0  ;;  %v5414_v63 = vand.u32 4294901760, %v4901_v48  ;;  %2991 = vmatprep.subr.mxu0 %v4890_v39  ;;  %3020 = vmatprep.subr.mxu1 %v2165_v30  ;;  %v5413_v37 = vand.u32 4294901760, %v4908_v4  ;;  %v4933_v52 = vand.u32 4294901760, %v1852_v45  ;;  %v1851_v0 = vld [vmem:[%s5256_s4 + $0x18] sm:$0xff] }
 0x29d   :  { %5644 = vst [vmem:[#allocation51_spill] sm:$0xff] %v4911_v2  ;;  %5645 = vst [vmem:[#allocation52_spill] sm:$0xff] %v4916_v50  ;;  %2992 = vmatpush3.msra.mxu0 %v4892_v6  ;;  %v5415_v54 = vand.u32 4294901760, %v4911_v2  ;;  %v5416_v1 = vand.u32 4294901760, %v4916_v50  ;;  %3021 = vmatpush3.msra.mxu1 %v2053_v9  ;;  %v2172_v49 = vand.u32 4294901760, %v2171_v62  ;;  %v4943_v14 = vsub.f32 %v1868_v26, %v4913_v53  ;;  %v1866_v26 = vld [vmem:[%s5256_s4 + $0x90] sm:$0xff] }
 0x29e   :  { %v2060_v13 = vand.u32 4294901760, %v2059_v19  ;;  %v2178_v30 = vsub.f32 %v4901_v48, %v5414_v63  ;;  %2993 = vmatprep.subr.mxu0 %v4913_v53  ;;  %v2066_v40 = vsub.f32 %v4908_v4, %v5413_v37  ;;  %v4955_v9 = vand.u32 4294901760, %v1867_v25 }
 0x29f   :  { %5646 = vst [vmem:[#allocation53_spill] sm:$0xff] %v4943_v14  ;;  %v2185_v28 = vsub.f32 %v4911_v2, %v5415_v54  ;;  %v2073_v62 = vsub.f32 %v4916_v50, %v5416_v1  ;;  %2994 = vmatpush3.msra.mxu0 %v4933_v52  ;;  %3022 = vmatprep.subr.mxu1 %v2172_v49  ;;  %v4964_v54 = vand.u32 4294901760, %v1851_v0  ;;  %v1850_v1 = vld [vmem:[%s5256_s4 + $0x10] sm:$0xff]  ;;  %v1865_v50 = vld [vmem:[%s5256_s4 + $0x88] sm:$0xff]  ;;  %v5650_v4 = vand.u32 4294901760, %v4943_v14 }
 0x2a0   :  { %v2179_v19 = vand.u32 4294901760, %v2178_v30  ;;  %v4962_v63 = vsub.f32 %v1852_v45, %v4933_v52  ;;  %v1849_v49 = vld [vmem:[%s5256_s4 + $0x8] sm:$0xff]  ;;  %3023 = vmatpush3.msra.mxu1 %v2060_v13  ;;  %v2067_v30 = vand.u32 4294901760, %v2066_v40  ;;  %2995 = vmatprep.subr.mxu0 %v4955_v9  ;;  %v4977_v45 = vsub.f32 %v1867_v25, %v4955_v9  ;;  %v1848_v13 = vld [vmem:[%s5256_s4] sm:$0xff] }
 0x2a1   :  { %5648 = vst [vmem:[#allocation55_spill] sm:$0xff] %v4964_v54  ;;  %v2186_v37 = vand.u32 4294901760, %v2185_v28  ;;  %v2074_v2 = vand.u32 4294901760, %v2073_v62  ;;  %v2192_v48 = vsub.f32 %v4943_v14, %v5650_v4  ;;  %2996 = vmatpush3.msra.mxu0 %v4964_v54  ;;  %v4984_v29 = vand.u32 4294901760, %v1866_v26  ;;  %v1864_v28 = vld [vmem:[%s5256_s4 + $0x80] sm:$0xff] }
 0x2a2   :  { %5647 = vst [vmem:[#allocation54_spill] sm:$0xff] %v4962_v63  ;;  %5649 = vst [vmem:[#allocation56_spill] sm:$0xff] %v4977_v45  ;;  %3024 = vmatprep.subr.mxu1 %v2179_v19  ;;  %v5433_v35 = vand.u32 4294901760, %v4962_v63  ;;  %v4987_v40 = vsub.f32 %v1851_v0, %v4964_v54  ;;  %v4993_v25 = vand.u32 4294901760, %v1850_v1  ;;  %v4995_v62 = vand.u32 4294901760, %v1865_v50 }
 0x2a3   :  { %5651 = vst [vmem:[#allocation57_spill] sm:$0xff] %v4984_v29  ;;  %3025 = vmatpush3.msra.mxu1 %v2067_v30  ;;  %v4997_v4 = vand.u32 4294901760, %v1849_v49  ;;  %v2193_v19 = vand.u32 4294901760, %v2192_v48  ;;  %2997 = vmatprep.subr.mxu0 %v4984_v29  ;;  %v5005_v30 = vsub.f32 %v1866_v26, %v4984_v29  ;;  %v5656_v54 = vand.u32 4294901760, %v4977_v45 }
 0x2a4   :  { %5652 = vst [vmem:[#allocation58_spill] sm:$0xff] %v4987_v40  ;;  %5653 = vst [vmem:[#allocation59_spill] sm:$0xff] %v4995_v62  ;;  %3026 = vmatprep.subr.mxu1 %v2186_v37  ;;  %v2080_v0 = vsub.f32 %v4962_v63, %v5433_v35  ;;  %2998 = vmatpush3.msra.mxu0 %v4993_v25  ;;  %v5015_v37 = vsub.f32 %v1850_v1, %v4993_v25  ;;  %v5020_v14 = vand.u32 4294901760, %v1864_v28 }
 0x2a5   :  { %5654 = vst [vmem:[#allocation60_spill] sm:$0xff] %v4997_v4  ;;  %5655 = vst [vmem:[#allocation61_spill] sm:$0xff] %v5005_v30  ;;  %3027 = vmatpush3.msra.mxu1 %v2074_v2  ;;  %v2199_v48 = vsub.f32 %v4977_v45, %v5656_v54  ;;  %v5018_v35 = vsub.f32 %v1865_v50, %v4995_v62  ;;  %v5659_v63 = vand.u32 4294901760, %v4987_v40  ;;  %v5442_v29 = vand.u32 4294901760, %v5005_v30 }
 0x2a6   :  { %5657 = vst [vmem:[#allocation62_spill] sm:$0xff] %v5015_v37  ;;  %3028 = vmatprep.subr.mxu1 %v2193_v19  ;;  %v2081_v26 = vand.u32 4294901760, %v2080_v0  ;;  %2999 = vmatprep.subr.mxu0 %v4995_v62  ;;  %v5028_v54 = vsub.f32 %v1849_v49, %v4997_v4  ;;  %v5445_v45 = vand.u32 4294901760, %v5015_v37  ;;  %v5033_v19 = vand.u32 4294901760, %v1848_v13 }
 0x2a7   :  { %5658 = vst [vmem:[#allocation63_spill] sm:$0xff] %v5018_v35  ;;  %v2087_v2 = vsub.f32 %v4987_v40, %v5659_v63  ;;  %v2200_v1 = vand.u32 4294901760, %v2199_v48  ;;  %3000 = vmatpush3.msra.mxu0 %v4997_v4  ;;  %v2206_v63 = vsub.f32 %v5005_v30, %v5442_v29  ;;  %v5041_v48 = vsub.f32 %v1864_v28, %v5020_v14 }
 0x2a8   :  { %3029 = vmatpush3.msra.mxu1 %v2081_v26  ;;  %3001 = vmatprep.subr.mxu0 %v5020_v14  ;;  %v2094_v50 = vsub.f32 %v5015_v37, %v5445_v45  ;;  %v5660_v40 = vand.u32 4294901760, %v5018_v35  ;;  %v5052_v29 = vsub.f32 %v1848_v13, %v5033_v19  ;;  %v5661_v28 = vand.u32 4294901760, %v5028_v54  ;;  %v5662_v45 = vld [vmem:[#allocation4_spill] sm:$0xff] }
 0x2a9   :  { %v2088_v0 = vand.u32 4294901760, %v2087_v2  ;;  %3030 = vmatprep.subr.mxu1 %v2200_v1  ;;  %3002 = vmatpush3.msra.mxu0 %v5033_v19  ;;  %v1843_v2 = vadd.f32 1.0, %v4813_v10  ;;  %v2207_v49 = vand.u32 4294901760, %v2206_v63  ;;  %v5451_v30 = vand.u32 4294901760, %v5041_v48 }
 0x2aa   :  { %v2213_v26 = vsub.f32 %v5018_v35, %v5660_v40  ;;  %v2101_v1 = vsub.f32 %v5028_v54, %v5661_v28  ;;  %3041 = vmatprep.subr.mxu0 %v4684_v11  ;;  %v2758_v37 = vmul.f32 -1.442695, %v5662_v45  ;;  %v2095_v40 = vand.u32 4294901760, %v2094_v50 }
 0x2ab   :  { %3031 = vmatpush3.msra.mxu1 %v2088_v0  ;;  %3184 = vrcp.f32 %v1843_v2  ;;  %v5450_v10 = vand.u32 4294901760, %v5052_v29  ;;  %v2220_v0 = vsub.f32 %v5041_v48, %v5451_v30  ;;  %v5674_v30 = vld [vmem:[#allocation54_spill] sm:$0xff] }
 0x2ac   :  { %v2214_v35 = vand.u32 4294901760, %v2213_v26  ;;  %3032 = vmatprep.subr.mxu1 %v2207_v49  ;;  %v2102_v13 = vand.u32 4294901760, %v2101_v1  ;;  %3186 = vpow2.f32 %v2758_v37 }
 0x2ad   :  { %3033 = vmatpush3.msra.mxu1 %v2095_v40  ;;  %v2108_v63 = vsub.f32 %v5052_v29, %v5450_v10  ;;  %v2221_v28 = vand.u32 4294901760, %v2220_v0  ;;  %v5673_v10 = vld [vmem:[#allocation53_spill] sm:$0xff] }
 0x2ae   :  { %3034 = vmatprep.subr.mxu1 %v2214_v35 }
 0x2af   :  { %3035 = vmatpush3.msra.mxu1 %v2102_v13  ;;  %v2109_v45 = vand.u32 4294901760, %v2108_v63 }
 0x2b0   :  { %3036 = vmatprep.subr.mxu1 %v2221_v28 }
 0x2b1   :  { %3037 = vmatpush3.msra.mxu1 %v2109_v45 }
 0x2b2   :  { %3076 = vmatprep.subr.mxu1 %v4655_v33 }
 0x2b8   :  { %v3185_v50 = vpop.eup %3184 }
 0x2b9   :  { %v3187_v49 = vpop.eup %3186  ;;  %v5068_v26 = vand.u32 4294901760, %v3185_v50 }
 0x2ba   :  { %v1842_v2 = vadd.f32 1.0, %v3187_v49  ;;  %v5665_v49 = vld [vmem:[#allocation47_spill] sm:$0xff] }
 0x2bb   :  { %5663 = vst [vmem:[#allocation64_spill] sm:$0xff] %v5068_v26  ;;  %v5071_v37 = vsub.f32 %v3185_v50, %v5068_v26  ;;  %2224 = vmatprep.mubr.f32.mxu1 %v5068_v26  ;;  %v5676_v26 = vld [vmem:[#allocation58_spill] sm:$0xff] }
 0x2bc   :  { %3188 = vrcp.f32 %v1842_v2  ;;  %v5666_v2 = vld [vmem:[#allocation48_spill] sm:$0xff] }
 0x2bd   :  { %v1985_v35 = vand.u32 4294901760, %v5071_v37 }
 0x2bf   :  { %v1986_v1 = vsub.f32 %v5071_v37, %v1985_v35 }
 0x2c1   :  { %v1987_v40 = vand.u32 4294901760, %v1986_v1  ;;  %v5668_v1 = vld [vmem:[#allocation49_spill] sm:$0xff] }
 0x2c3   :  { %1988 = vmatprep.mubr.f32.mxu0 %v1987_v40  ;;  %v5669_v40 = vld [vmem:[#allocation57_spill] sm:$0xff] }
 0x2c9   :  { %v3189_v13 = vpop.eup %3188 }
 0x2ca   :  { %v5076_v0 = vand.u32 4294901760, %v3189_v13 }
 0x2cc   :  { %5664 = vst [vmem:[#allocation65_spill] sm:$0xff] %v5076_v0  ;;  %v5079_v63 = vsub.f32 %v3189_v13, %v5076_v0  ;;  %2226 = vmatmul.mubr.f32.vlgmr.msra.gmra.mxu1 %v5076_v0  ;;  %v5670_v13 = vld [vmem:[#allocation50_spill] sm:$0xff]  ;;  %v5675_v0 = vld [vmem:[#allocation56_spill] sm:$0xff] }
 0x2cd   :  { %3077 = vmatpush3.msra.mxu1 %v4657_v15  ;;  %2468 = vmatprep.mubr.f32.mxu1 %v1985_v35  ;;  %v5667_v35 = vld [vmem:[#allocation55_spill] sm:$0xff] }
 0x2ce   :  { %v1991_v28 = vand.u32 4294901760, %v5079_v63  ;;  %3078 = vmatprep.subr.mxu1 %v4659_v17 }
 0x2cf   :  { %3079 = vmatpush3.msra.mxu1 %v4670_v5 }
 0x2d0   :  { %v1992_v45 = vsub.f32 %v5079_v63, %v1991_v28  ;;  %3080 = vmatprep.subr.mxu1 %v4672_v46 }
 0x2d1   :  { %3081 = vmatpush3.msra.mxu1 %v4674_v60 }
 0x2d2   :  { %v1993_v50 = vand.u32 4294901760, %v1992_v45  ;;  %3082 = vmatprep.subr.mxu1 %v4692_v20  ;;  %v5671_v45 = vld [vmem:[#allocation51_spill] sm:$0xff] }
 0x2d3   :  { %3083 = vmatpush3.msra.mxu1 %v4707_v55 }
 0x2d4   :  { %1994 = vmatmul.mubr.f32.vlgmr.msra.gmra.mxu0 %v1993_v50  ;;  %3084 = vmatprep.subr.mxu1 %v4720_v27  ;;  %v5672_v50 = vld [vmem:[#allocation52_spill] sm:$0xff] }
 0x2d5   :  { %3042 = vmatpush3.msra.mxu0 %v4687_v12  ;;  %3085 = vmatpush3.msra.mxu1 %v4771_v56 }
 0x2d6   :  { %3043 = vmatprep.subr.mxu0 %v4690_v23  ;;  %3086 = vmatprep.subr.mxu1 %v4776_v32 }
 0x2d7   :  { %3044 = vmatpush3.msra.mxu0 %v4699_v31  ;;  %3087 = vmatpush3.msra.mxu1 %v4781_v8 }
 0x2d8   :  { %3045 = vmatprep.subr.mxu0 %v4702_v43  ;;  %3088 = vmatprep.subr.mxu1 %v4783_v16 }
 0x2d9   :  { %3046 = vmatpush3.msra.mxu0 %v4705_v51  ;;  %3089 = vmatpush3.msra.mxu1 %v4785_v3 }
 0x2da   :  { %3047 = vmatprep.subr.mxu0 %v4714_v38  ;;  %3090 = vmatprep.subr.mxu1 %v4798_v22 }
 0x2db   :  { %3048 = vmatpush3.msra.mxu0 %v4744_v41  ;;  %3091 = vmatpush3.msra.mxu1 %v4821_v42 }
 0x2dc   :  { %3049 = vmatprep.subr.mxu0 %v4774_v7  ;;  %3092 = vmatprep.subr.mxu1 %v4840_v61 }
 0x2dd   :  { %3050 = vmatpush3.msra.mxu0 %v4793_v34  ;;  %3093 = vmatpush3.msra.mxu1 %v4860_v24 }
 0x2de   :  { %3051 = vmatprep.subr.mxu0 %v4796_v44  ;;  %3094 = vmatprep.subr.mxu1 %v4880_v36 }
 0x2df   :  { %3052 = vmatpush3.msra.mxu0 %v4802_v21  ;;  %3095 = vmatpush3.msra.mxu1 %v4888_v18 }
 0x2e0   :  { %3053 = vmatprep.subr.mxu0 %v4805_v59  ;;  %3096 = vmatprep.subr.mxu1 %v4890_v39 }
 0x2e1   :  { %3054 = vmatpush3.msra.mxu0 %v4808_v58  ;;  %3097 = vmatpush3.msra.mxu1 %v4892_v6 }
 0x2e2   :  { %3055 = vmatprep.subr.mxu0 %v4828_v47  ;;  %3098 = vmatprep.subr.mxu1 %v4913_v53 }
 0x2e3   :  { %3056 = vmatpush3.msra.mxu0 %v4858_v57  ;;  %3099 = vmatpush3.msra.mxu1 %v4933_v52 }
 0x2e4   :  { %3057 = vmatprep.subr.mxu0 %v5665_v49  ;;  %3100 = vmatprep.subr.mxu1 %v4955_v9 }
 0x2e5   :  { %3058 = vmatpush3.msra.mxu0 %v5666_v2  ;;  %3101 = vmatpush3.msra.mxu1 %v5667_v35 }
 0x2e6   :  { %3059 = vmatprep.subr.mxu0 %v5668_v1  ;;  %3102 = vmatprep.subr.mxu1 %v5669_v40 }
 0x2e7   :  { %3060 = vmatpush3.msra.mxu0 %v5670_v13  ;;  %3103 = vmatpush3.msra.mxu1 %v4993_v25 }
 0x2e8   :  { %3061 = vmatprep.subr.mxu0 %v5671_v45  ;;  %3104 = vmatprep.subr.mxu1 %v4995_v62  ;;  %v5677_v62 = vld [vmem:[#allocation61_spill] sm:$0xff] }
 0x2e9   :  { %3062 = vmatpush3.msra.mxu0 %v5672_v50  ;;  %3105 = vmatpush3.msra.mxu1 %v4997_v4  ;;  %v5678_v4 = vld [vmem:[#allocation62_spill] sm:$0xff] }
 0x2ea   :  { %3063 = vmatprep.subr.mxu0 %v5673_v10  ;;  %2361 = vmatprep.mubr.f32.mxu0 %v5071_v37  ;;  %v5679_v37 = vld [vmem:[#allocation63_spill] sm:$0xff] }
 0x2eb   :  { %3064 = vmatpush3.msra.mxu0 %v5674_v30  ;;  %3106 = vmatprep.subr.mxu1 %v5020_v14 }
 0x2ec   :  { %3065 = vmatprep.subr.mxu0 %v5675_v0  ;;  %3107 = vmatpush3.msra.mxu1 %v5033_v19 }
 0x2ed   :  { %3066 = vmatpush3.msra.mxu0 %v5676_v26  ;;  %2472 = vmatmul.mubr.f32.vlgmr.msra.gmra.mxu1 %v1991_v28 }
 0x2ee   :  { %3067 = vmatprep.subr.mxu0 %v5677_v62  ;;  %3146 = vmatprep.subr.mxu1 %v4655_v33  ;;  %v5680_v33 = vand.u32 4294901760, %v4684_v11  ;;  %v5686_v11 = vand.u32 4294901760, %v4714_v38  ;;  %v5694_v38 = vand.u32 4294901760, %v4828_v47  ;;  %v5713_v47 = vld [vmem:[#allocation65_spill] sm:$0xff] }
 0x2ef   :  { %3068 = vmatpush3.msra.mxu0 %v5678_v4  ;;  %3147 = vmatpush3.msra.mxu1 %v4657_v15  ;;  %v5681_v15 = vand.u32 4294901760, %v4687_v12  ;;  %v5687_v12 = vand.u32 4294901760, %v4744_v41  ;;  %v5696_v41 = vand.u32 4294901760, %v5665_v49 }
 0x2f0   :  { %3069 = vmatprep.subr.mxu0 %v5679_v37  ;;  %3148 = vmatprep.subr.mxu1 %v4659_v17  ;;  %v5682_v17 = vand.u32 4294901760, %v4690_v23  ;;  %v5688_v23 = vand.u32 4294901760, %v4774_v7  ;;  %v5698_v7 = vand.u32 4294901760, %v5668_v1 }
 0x2f1   :  { %3070 = vmatpush3.msra.mxu0 %v5028_v54  ;;  %3149 = vmatpush3.msra.mxu1 %v4670_v5  ;;  %v5683_v5 = vand.u32 4294901760, %v4699_v31  ;;  %v5690_v31 = vand.u32 4294901760, %v4796_v44  ;;  %v5705_v44 = vand.u32 4294901760, %v5675_v0 }
 0x2f2   :  { %3071 = vmatprep.subr.mxu0 %v5041_v48  ;;  %3150 = vmatprep.subr.mxu1 %v4672_v46  ;;  %v5684_v46 = vand.u32 4294901760, %v4702_v43  ;;  %v5691_v43 = vand.u32 4294901760, %v4802_v21  ;;  %v5707_v21 = vand.u32 4294901760, %v5676_v26 }
 0x2f3   :  { %3072 = vmatpush3.msra.mxu0 %v5052_v29  ;;  %3151 = vmatpush3.msra.mxu1 %v4674_v60  ;;  %v5685_v60 = vand.u32 4294901760, %v4705_v51  ;;  %v5692_v51 = vand.u32 4294901760, %v4805_v59  ;;  %v5708_v59 = vld [vmem:[#allocation64_spill] sm:$0xff] }
 0x2f4   :  { %2364 = vmatmul.mubr.f32.vlgmr.msra.gmra.mxu0 %v5079_v63  ;;  %3111 = vmatprep.subr.mxu0 %v5680_v33 }
 0x2f5   :  { %3112 = vmatpush3.msra.mxu0 %v5681_v15  ;;  %3152 = vmatprep.subr.mxu1 %v4692_v20  ;;  %v5689_v20 = vand.u32 4294901760, %v4793_v34  ;;  %v5704_v34 = vld [vmem:[#allocation59_spill] sm:$0xff] }
 0x2f6   :  { %3113 = vmatprep.subr.mxu0 %v5682_v17  ;;  %3153 = vmatpush3.msra.mxu1 %v4707_v55  ;;  %v5693_v55 = vand.u32 4294901760, %v4808_v58  ;;  %v5709_v58 = vand.u32 4294901760, %v5677_v62 }
 0x2f7   :  { %3114 = vmatpush3.msra.mxu0 %v5683_v5  ;;  %3154 = vmatprep.subr.mxu1 %v4720_v27  ;;  %v5695_v27 = vand.u32 4294901760, %v4858_v57 }
 0x2f8   :  { %3115 = vmatprep.subr.mxu0 %v5684_v46  ;;  %3155 = vmatpush3.msra.mxu1 %v4771_v56  ;;  %v5697_v56 = vand.u32 4294901760, %v5666_v2 }
 0x2f9   :  { %3116 = vmatpush3.msra.mxu0 %v5685_v60  ;;  %3156 = vmatprep.subr.mxu1 %v4776_v32  ;;  %v5699_v32 = vand.u32 4294901760, %v5670_v13 }
 0x2fa   :  { %3117 = vmatprep.subr.mxu0 %v5686_v11  ;;  %3157 = vmatpush3.msra.mxu1 %v4781_v8  ;;  %v5700_v8 = vand.u32 4294901760, %v5671_v45 }
 0x2fb   :  { %3118 = vmatpush3.msra.mxu0 %v5687_v12  ;;  %3158 = vmatprep.subr.mxu1 %v4783_v16  ;;  %v5701_v16 = vand.u32 4294901760, %v5672_v50 }
 0x2fc   :  { %3119 = vmatprep.subr.mxu0 %v5688_v23  ;;  %3159 = vmatpush3.msra.mxu1 %v4785_v3  ;;  %v5703_v3 = vand.u32 4294901760, %v5674_v30 }
 0x2fd   :  { %3120 = vmatpush3.msra.mxu0 %v5689_v20  ;;  %3160 = vmatprep.subr.mxu1 %v4798_v22  ;;  %v5706_v22 = vld [vmem:[#allocation60_spill] sm:$0xff] }
 0x2fe   :  { %3121 = vmatprep.subr.mxu0 %v5690_v31  ;;  %3161 = vmatpush3.msra.mxu1 %v4821_v42  ;;  %v5712_v42 = vand.u32 4294901760, %v5028_v54 }
 0x2ff   :  { %3122 = vmatpush3.msra.mxu0 %v5691_v43  ;;  %3162 = vmatprep.subr.mxu1 %v4840_v61  ;;  %v5714_v61 = vand.u32 4294901760, %v5041_v48 }
 0x300   :  { %3123 = vmatprep.subr.mxu0 %v5692_v51  ;;  %3163 = vmatpush3.msra.mxu1 %v4860_v24 }
 0x301   :  { %3124 = vmatpush3.msra.mxu0 %v5693_v55  ;;  %3164 = vmatprep.subr.mxu1 %v4880_v36  ;;  %v5711_v36 = vand.u32 4294901760, %v5679_v37 }
 0x302   :  { %3125 = vmatprep.subr.mxu0 %v5694_v38  ;;  %3165 = vmatpush3.msra.mxu1 %v4888_v18 }
 0x303   :  { %3126 = vmatpush3.msra.mxu0 %v5695_v27  ;;  %3166 = vmatprep.subr.mxu1 %v4890_v39 }
 0x304   :  { %3127 = vmatprep.subr.mxu0 %v5696_v41  ;;  %3167 = vmatpush3.msra.mxu1 %v4892_v6  ;;  %v5710_v6 = vand.u32 4294901760, %v5678_v4 }
 0x305   :  { %3128 = vmatpush3.msra.mxu0 %v5697_v56  ;;  %3168 = vmatprep.subr.mxu1 %v4913_v53  ;;  %v5702_v53 = vand.u32 4294901760, %v5673_v10 }
 0x306   :  { %3129 = vmatprep.subr.mxu0 %v5698_v7  ;;  %3169 = vmatpush3.msra.mxu1 %v4933_v52 }
 0x307   :  { %3130 = vmatpush3.msra.mxu0 %v5699_v32  ;;  %3170 = vmatprep.subr.mxu1 %v4955_v9 }
 0x308   :  { %3131 = vmatprep.subr.mxu0 %v5700_v8  ;;  %3171 = vmatpush3.msra.mxu1 %v5667_v35 }
 0x309   :  { %3132 = vmatpush3.msra.mxu0 %v5701_v16  ;;  %3172 = vmatprep.subr.mxu1 %v5669_v40 }
 0x30a   :  { %3133 = vmatprep.subr.mxu0 %v5702_v53  ;;  %3173 = vmatpush3.msra.mxu1 %v4993_v25  ;;  %v2760_v25 = vld [vmem:[%s5257_s5] ss:$0 sm:$0xff] }
 0x30b   :  { %3134 = vmatpush3.msra.mxu0 %v5703_v3  ;;  %3174 = vmatprep.subr.mxu1 %v5704_v34 }
 0x30c   :  { %3135 = vmatprep.subr.mxu0 %v5705_v44  ;;  %3175 = vmatpush3.msra.mxu1 %v5706_v22 }
 0x30d   :  { %3136 = vmatpush3.msra.mxu0 %v5707_v21  ;;  %2638 = vmatprep.mubr.f32.mxu0 %v5708_v59 }
 0x30e   :  { %3137 = vmatprep.subr.mxu0 %v5709_v58  ;;  %3176 = vmatprep.subr.mxu1 %v5020_v14  ;;  %v5715_v14 = vand.u32 4294901760, %v5052_v29 }
 0x30f   :  { %3138 = vmatpush3.msra.mxu0 %v5710_v6  ;;  %3177 = vmatpush3.msra.mxu1 %v5033_v19 }
 0x310   :  { %3139 = vmatprep.subr.mxu0 %v5711_v36  ;;  %2742 = vmatprep.mubr.f32.mxu1 %v5708_v59 }
 0x311   :  { %3140 = vmatpush3.msra.mxu0 %v5712_v42  ;;  %2744 = vmatmul.mubr.f32.vlgmr.msra.gmra.mxu1 %v5713_v47 }
 0x312   :  { %3141 = vmatprep.subr.mxu0 %v5714_v61 }
 0x313   :  { %3142 = vmatpush3.msra.mxu0 %v5715_v14 }
 0x314   :  { %2640 = vmatmul.mubr.f32.vlgmr.msra.gmra.mxu0 %v5713_v47 }
 0x38c   :  { %v3038_v57 = vpop.f32.mrf.mxu1 }
 0x38e   :  { %v3039_v9 = vpop.f32.mrf.mxu1 }
 0x38f   :  { %v3040_v54 = vadd.f32 %v3039_v9, %v3038_v57 }
 0x394   :  { %v3003_v18 = vpop.f32.mrf.mxu0 }
 0x396   :  { %v3004_v24 = vpop.f32.mrf.mxu0 }
 0x397   :  { %v3005_v52 = vadd.f32 %v3004_v24, %v3003_v18 }
 0x399   :  { %v1996_v30 = vadd.f32 %v3005_v52, %v2760_v25 }
 0x39b   :  { %v2228_v29 = vadd.f32 %v3040_v54, %v1996_v30 }
 0x3ad   :  { %v3108_v62 = vpop.f32.mrf.mxu1 }
 0x3af   :  { %v3109_v48 = vpop.f32.mrf.mxu1 }
 0x3b0   :  { %v3110_v0 = vadd.f32 %v3109_v48, %v3108_v62 }
 0x3b4   :  { %v3073_v39 = vpop.f32.mrf.mxu0 }
 0x3b6   :  { %v3074_v4 = vpop.f32.mrf.mxu0 }
 0x3b7   :  { %v3075_v19 = vadd.f32 %v3074_v4, %v3073_v39 }
 0x3b9   :  { %v2366_v26 = vadd.f32 %v3075_v19, %v2228_v29 }
 0x3bb   :  { %v2474_v2 = vadd.f32 %v3110_v0, %v2366_v26 }
 0x3d1   :  { %v3178_v10 = vpop.f32.mrf.mxu1 }
 0x3d3   :  { %v3179_v28 = vpop.f32.mrf.mxu1 }
 0x3d4   :  { %v3143_v63 = vpop.f32.mrf.mxu0  ;;  %v3180_v1 = vadd.f32 %v3179_v28, %v3178_v10 }
 0x3d6   :  { %v3144_v49 = vpop.f32.mrf.mxu0 }
 0x3d7   :  { %v3145_v35 = vadd.f32 %v3144_v49, %v3143_v63 }
 0x3d9   :  { %v2642_v40 = vadd.f32 %v3145_v35, %v2474_v2 }
 0x3db   :  { %v2746_v13 = vadd.f32 %v3180_v1, %v2642_v40 }
 0x3dd   :  { %2750 = vst.msk [vmem:[%s5258_s6] sm:$0xff] %vm2749_vm1, %v2746_v13 }
 0x3de PF:  {}

</bundles_post_ra>
